<compile_context>
chip_gen: v7x
topology: tpu7x:2x2x1
jax: 0.10.0
libtpu: 0.0.40
codegen_flags: <defaults>
</compile_context>

<pallas_src>
import math
import functools

import jax
import jax.numpy as jnp
from jax.experimental import pallas as pl
from jax.experimental.pallas import tpu as pltpu


# ----------------------------------------------------------------------------
# Kernel
# ----------------------------------------------------------------------------
def _perm_weights_kernel(src_ref, ref_ref,
                         w1_ref, b1_ref, w2_ref, b2_ref, w3_ref, b3_ref,
                         perm_ref, wts_ref,
                         *, inv_sqrt_dk):
    bt, n, c = src_ref.shape           # Bt batch elems, N points, C channels
    m = ref_ref.shape[1]               # M reference points
    p = bt * n                         # lane-dense point axis for the conv slab

    # Channels-last inputs (no in-kernel transposes). bf16 copies feed the MXU.
    src_bf = src_ref[...].astype(jnp.bfloat16)      # [Bt, N, C]
    ref_bf = ref_ref[...].astype(jnp.bfloat16)      # [Bt, M, C]

    # ---- attention scores + softmax (bf16 MXU operands, f32 accumulate) -----
    scores = jnp.einsum('bnc,bmc->bnm', src_bf, ref_bf,
                        preferred_element_type=jnp.float32) * inv_sqrt_dk
    # TODO(synk): optional part_match_matrix masking (scores[mask == 0] = -1e10)
    # is not wired in; the reference module's default path passes None.

    s_max = jnp.max(scores, axis=-1, keepdims=True)
    e = jnp.exp(scores - s_max)
    denom = jnp.sum(e, axis=-1, keepdims=True)
    # Exact reciprocal: the returned permutation stays row-stochastic
    # (review correctness note); the cost on a [Bt, N, 1] operand is negligible.
    perm = e * pl.reciprocal(denom)                 # [Bt, N, M] f32

    # Single bulk, lane-dense permutation writeback (no scratch, no masked loop).
    perm_ref[...] = perm.reshape(bt, n * m)

    # ---- permuted gather of the reference features (MXU, bf16 operands) -----
    refp = jnp.einsum('bnm,bmc->bnc', perm.astype(jnp.bfloat16), ref_bf,
                      preferred_element_type=jnp.float32)     # [Bt, N, C]

    # ---- 1x1-conv stack (BN folded), lane-dense [P, channels] layout --------
    # Fused first conv: channel concat of src / ref_perm against the full
    # pre-concatenated [2C, 2C] W1^T (one matmul, K = 2C).
    x = jnp.concatenate(
        [src_bf.reshape(p, c), refp.astype(jnp.bfloat16).reshape(p, c)],
        axis=-1)                                              # [P, 2C] bf16

    h1 = jnp.dot(x, w1_ref[...], preferred_element_type=jnp.float32) + b1_ref[...]
    h1 = jnp.maximum(h1, 0.0)                                 # [P, 2C] f32

    h2 = jnp.dot(h1.astype(jnp.bfloat16), w2_ref[...],
                 preferred_element_type=jnp.float32) + b2_ref[...]
    h2 = jnp.maximum(h2, 0.0)                                 # [P, C] f32

    # Final 1-channel conv on the (otherwise idle) MXU — no transpose, no
    # cross-sublane reduce.  Scalar bias lives in SMEM.
    logits = jnp.dot(h2.astype(jnp.bfloat16), w3_ref[...],
                     preferred_element_type=jnp.float32) + b3_ref[0]   # [P, 1]
    wts_ref[...] = jax.nn.sigmoid(logits).astype(wts_ref.dtype)


# ----------------------------------------------------------------------------
# Generation-aware tiling helpers
# ----------------------------------------------------------------------------
def _pad2d_bytes(rows, cols, itemsize):
    """Bytes of a 2-D VMEM tile after (8, 128) padding."""
    return ((rows + 7) // 8 * 8) * ((cols + 127) // 128 * 128) * itemsize


def _tile_footprint_bytes(bt, n, m, c):
    """Approximate per-grid-step VMEM footprint (padded, double-buffered I/O)."""
    c2 = 2 * c
    p = bt * n
    fp = 0
    # double-buffered input blocks (f32, channels-last)
    fp += 2 * bt * _pad2d_bytes(n, c, 4)
    fp += 2 * bt * _pad2d_bytes(m, c, 4)
    # double-buffered output blocks
    fp += 2 * _pad2d_bytes(bt, n * m, 4)          # permutation slab
    fp += 2 * _pad2d_bytes(p, 1, 4)               # point-weight column
    # resident conv parameters (bf16 weights, f32 biases)
    fp += _pad2d_bytes(c2, c2, 2) + _pad2d_bytes(c2, c, 2) + _pad2d_bytes(c, 1, 2)
    fp += _pad2d_bytes(1, c2, 4) + _pad2d_bytes(1, c, 4)
    # in-kernel live intermediates (f32): scores/exp/perm, gather, conv slabs
    fp += 3 * bt * _pad2d_bytes(n, m, 4)
    fp += bt * _pad2d_bytes(n, c, 4)
    fp += 2 * _pad2d_bytes(p, c2, 4) + _pad2d_bytes(p, c, 4)
    return fp


def _generation_params():
    """(tensorcores per chip, vmem_limit cap, per-step tile budget) by device."""
    try:
        kind = jax.devices()[0].device_kind.lower()
    except Exception:
        kind = ""
    if "v7" in kind:
        # 2 TensorCores / chip, only 64 MiB VMEM per core.
        return 2, 32 * 1024 * 1024, 24 * 1024 * 1024
    if "v4" in kind or ("v5" in kind and "lite" not in kind and "v5e" not in kind):
        # v4 / v5p megacore: 2 TensorCores share the chip, 128 MiB VMEM.
        return 2, 96 * 1024 * 1024, 48 * 1024 * 1024
    # v5e / v6e: single TensorCore, 128 MiB VMEM.
    return 1, 96 * 1024 * 1024, 80 * 1024 * 1024


def _choose_block_batch(batch, n, m, c, num_cores, budget):
    """Largest Bt (divisor of `batch`) whose tile fits the per-step VMEM budget,
    preferring (a) G = batch/Bt a multiple of the TensorCore count (so the
    'parallel' grid axis shards across cores on v7x / megacore chips) and
    (b) a lane-dense Bt*N >= 128 conv slab.  On single-core chips this
    collapses to Bt = batch (one grid step, minimal per-step overhead)."""
    divisors = [d for d in range(batch, 0, -1) if batch % d == 0]

    def admissible(bt, want_cores, want_lanes):
        g = batch // bt
        if bt != batch and bt % 8 != 0:           # output-block sublane rule
            return False
        if want_cores and g % num_cores != 0:
            return False
        if want_lanes and bt != batch and bt * n < 128:
            return False
        return _tile_footprint_bytes(bt, n, m, c) <= budget

    for want_cores, want_lanes in ((True, True), (True, False),
                                   (False, True), (False, False)):
        for bt in divisors:
            if admissible(bt, want_cores, want_lanes):
                return bt
    return batch


# ----------------------------------------------------------------------------
# Wrapper
# ----------------------------------------------------------------------------
def permutation_weights(features_src, features_ref,
                        w1f, b1f, w2f, b2f, w3, b3, *, block_batch=None):
    """features_src: [B, C, N], features_ref: [B, C, M] (channels-first, as in
    the PyTorch module).  w1f/b1f, w2f/b2f are BN-folded conv1/conv2 params;
    w3/b3 is the last conv.  Returns (permutation [B, N, M] f32, weights_s
    [B, N] f32)."""
    B, C, N = features_src.shape
    _, _, M = features_ref.shape
    C2 = 2 * C

    num_cores, vmem_cap, tile_budget = _generation_params()
    Bt = (_choose_block_batch(B, N, M, C, num_cores, tile_budget)
          if block_batch is None else block_batch)
    assert B % Bt == 0
    G = B // Bt                      # grid extent (batch groups)
    P = Bt * N                       # lane-dense point axis per grid step

    # Wrapper-side layout plumbing only: channels-last inputs so the kernel has
    # no XLU transposes and the DMA minor dim is the channel axis.
    src_nlc = jnp.transpose(features_src, (0, 2, 1))   # [B, N, C]
    ref_mlc = jnp.transpose(features_ref, (0, 2, 1))   # [B, M, C]

    # MXU operands in bf16 (f32 accumulation in-kernel); biases stay f32.
    w1_t = jnp.asarray(w1f.T, dtype=jnp.bfloat16)      # [2C, 2C]  (pre-concat)
    w2_t = jnp.asarray(w2f.T, dtype=jnp.bfloat16)      # [2C, C]
    w3_col = jnp.asarray(w3, jnp.bfloat16).reshape(C, 1)
    b1_row = jnp.asarray(b1f, jnp.float32).reshape(1, C2)
    b2_row = jnp.asarray(b2f, jnp.float32).reshape(1, C)
    b3_s = jnp.asarray(b3, jnp.float32).reshape(1)

    vmem_limit = max(8 * 1024 * 1024,
                     min(vmem_cap, _tile_footprint_bytes(Bt, N, M, C) * 4 // 3))

    kernel = functools.partial(_perm_weights_kernel,
                               inv_sqrt_dk=1.0 / math.sqrt(C))

    perm_slab, wts_col = pl.pallas_call(
        kernel,
        out_shape=(jax.ShapeDtypeStruct((B, N * M), jnp.float32),
                   jax.ShapeDtypeStruct((B * N, 1), jnp.float32)),
        grid_spec=pltpu.PrefetchScalarGridSpec(
            num_scalar_prefetch=0,
            grid=(G,),
            in_specs=[
                pl.BlockSpec((Bt, N, C), lambda g: (g, 0, 0)),      # src (NLC)
                pl.BlockSpec((Bt, M, C), lambda g: (g, 0, 0)),      # ref (MLC)
                pl.BlockSpec((C2, C2), lambda g: (0, 0)),           # W1^T (bf16)
                pl.BlockSpec((1, C2), lambda g: (0, 0)),            # b1
                pl.BlockSpec((C2, C), lambda g: (0, 0)),            # W2^T (bf16)
                pl.BlockSpec((1, C), lambda g: (0, 0)),             # b2
                pl.BlockSpec((C, 1), lambda g: (0, 0)),             # w3 column
                pl.BlockSpec(memory_space=pltpu.MemorySpace.SMEM),  # b3 scalar
            ],
            out_specs=(
                pl.BlockSpec((Bt, N * M), lambda g: (g, 0)),        # perm slab
                pl.BlockSpec((P, 1), lambda g: (g, 0)),             # weights col
            ),
        ),
        compiler_params=pltpu.CompilerParams(
            dimension_semantics=("parallel",),
            vmem_limit_bytes=vmem_limit),
    )(src_nlc, ref_mlc, w1_t, b1_row, w2_t, b2_row, w3_col, b3_s)

    # Wrapper-side layout plumbing only (no extra compute).
    return perm_slab.reshape(B, N, M), wts_col.reshape(B, N)


# ----------------------------------------------------------------------------
# BN folding + pure-JAX reference
# ----------------------------------------------------------------------------
def _fold_bn(W, b, gamma, beta, mean, var, eps=1e-5):
    """Fold eval-mode BatchNorm1d into a preceding 1x1 conv (W: [O, I], b: [O])."""
    scale = gamma / jnp.sqrt(var + eps)
    return W * scale[:, None], scale * (b - mean) + beta


def _reference(src, refr, params):
    """Pure-JAX reference mirroring the PyTorch forward (eval-mode BN, f32)."""
    (W1, b1, g1, be1, m1, v1, W2, b2, g2, be2, m2, v2, W3, b3) = params
    C = src.shape[1]
    eps = 1e-5
    scores = jnp.einsum('bcn,bcm->bnm', src, refr) / math.sqrt(C)
    perm = jax.nn.softmax(scores, axis=-1)
    ref_perm = jnp.einsum('bnm,bcm->bcn', perm, refr)
    x = jnp.concatenate([src, ref_perm], axis=1)                      # [B, 2C, N]
    h = jnp.einsum('oi,bin->bon', W1, x) + b1[None, :, None]
    h = (h - m1[None, :, None]) / jnp.sqrt(v1 + eps)[None, :, None] \
        * g1[None, :, None] + be1[None, :, None]
    h = jnp.maximum(h, 0.0)
    h = jnp.einsum('oi,bin->bon', W2, h) + b2[None, :, None]
    h = (h - m2[None, :, None]) / jnp.sqrt(v2 + eps)[None, :, None] \
        * g2[None, :, None] + be2[None, :, None]
    h = jnp.maximum(h, 0.0)
    h = jnp.einsum('oi,bin->bon', W3, h) + b3[None, :, None]          # [B, 1, N]
    return perm, jax.nn.sigmoid(h[:, 0, :])


if __name__ == "__main__":
    # Small shapes consistent with the module: in_dim (channels) = 32,
    # 16 src/ref points, 16 batch elements (Bt=16/G=1 on single-TC chips,
    # Bt=8/G=2 on two-TC chips).
    B, C, N, M = 16, 32, 16, 16
    C2 = 2 * C

    key = jax.random.PRNGKey(0)
    ks = jax.random.split(key, 16)

    def u(k, shape, bound):
        return jax.random.uniform(k, shape, jnp.float32, -bound, bound)

    # Conv1d(2C -> 2C, k=1), Conv1d(2C -> C, k=1), Conv1d(C -> 1, k=1)
    W1 = u(ks[0], (C2, C2), 1.0 / math.sqrt(C2)); b1 = u(ks[1], (C2,), 1.0 / math.sqrt(C2))
    W2 = u(ks[2], (C, C2), 1.0 / math.sqrt(C2)); b2 = u(ks[3], (C,), 1.0 / math.sqrt(C2))
    W3 = u(ks[4], (1, C), 1.0 / math.sqrt(C));   b3 = u(ks[5], (1,), 1.0 / math.sqrt(C))

    # BatchNorm1d params (eval mode); perturbed so the fold is exercised.
    g1 = 1.0 + 0.1 * jax.random.normal(ks[6], (C2,), jnp.float32)
    be1 = 0.1 * jax.random.normal(ks[7], (C2,), jnp.float32)
    m1 = 0.1 * jax.random.normal(ks[8], (C2,), jnp.float32)
    v1 = 1.0 + 0.1 * jax.random.uniform(ks[9], (C2,), jnp.float32)
    g2 = 1.0 + 0.1 * jax.random.normal(ks[10], (C,), jnp.float32)
    be2 = 0.1 * jax.random.normal(ks[11], (C,), jnp.float32)
    m2 = 0.1 * jax.random.normal(ks[12], (C,), jnp.float32)
    v2 = 1.0 + 0.1 * jax.random.uniform(ks[13], (C,), jnp.float32)

    features_src = jax.random.normal(ks[14], (B, C, N), jnp.float32)
    features_ref = jax.random.normal(ks[15], (B, C, M), jnp.float32)

    # Fold BN into the 1x1 convs (glue, plain JAX, eval-mode semantics).
    W1f, b1f = _fold_bn(W1, b1, g1, be1, m1, v1)
    W2f, b2f = _fold_bn(W2, b2, g2, be2, m2, v2)

    perm, weights_s = permutation_weights(features_src, features_ref,
                                          W1f, b1f, W2f, b2f, W3, b3)
    jax.block_until_ready((perm, weights_s))

    # Sanity check against a pure-JAX f32 reference of the PyTorch forward.
    # Tolerances account for bf16 MXU operands in the attention matmuls and the
    # conv stack (all with f32 accumulation); the softmax normalization itself
    # uses the exact reciprocal.
    ref_perm, ref_w = _reference(features_src, features_ref,
                                 (W1, b1, g1, be1, m1, v1,
                                  W2, b2, g2, be2, m2, v2, W3, b3))
    assert perm.shape == (B, N, M) and weights_s.shape == (B, N)
    assert jnp.allclose(perm, ref_perm, atol=2e-2, rtol=2e-2)
    assert jnp.allclose(weights_s, ref_w, atol=4e-2, rtol=4e-2)

    print("KERNEL_OK")
</pallas_src>

<mosaic_0001>
module attributes {stable_mosaic.version = 11 : i64} {
  func.func @_perm_weights_kernel(%arg0: i32, %arg1: memref<16x16x32xf32, #tpu.memory_space<vmem>>, %arg2: memref<16x16x32xf32, #tpu.memory_space<vmem>>, %arg3: memref<64x64xbf16, #tpu.memory_space<vmem>>, %arg4: memref<1x64xf32, #tpu.memory_space<vmem>>, %arg5: memref<64x32xbf16, #tpu.memory_space<vmem>>, %arg6: memref<1x32xf32, #tpu.memory_space<vmem>>, %arg7: memref<32x1xbf16, #tpu.memory_space<vmem>>, %arg8: memref<1xf32, #tpu.memory_space<smem>>, %arg9: memref<16x256xf32, #tpu.memory_space<vmem>>, %arg10: memref<256x1xf32, #tpu.memory_space<vmem>>) attributes {dimension_semantics = [#tpu.dimension_semantics<parallel>], iteration_bounds = array<i64: 1>, scalar_prefetch = 0 : i64, scratch_operands = 0 : i64, tpu.core_type = #tpu.core_type<tc>, window_params = [{transform_indices = @transform_0, window_bounds = array<i64: 16, 16, 32>}, {transform_indices = @transform_1, window_bounds = array<i64: 16, 16, 32>}, {pipeline_mode = #tpu.pipeline_mode<synchronous>, transform_indices = @transform_2, window_bounds = array<i64: 64, 64>}, {pipeline_mode = #tpu.pipeline_mode<synchronous>, transform_indices = @transform_3, window_bounds = array<i64: 1, 64>}, {pipeline_mode = #tpu.pipeline_mode<synchronous>, transform_indices = @transform_4, window_bounds = array<i64: 64, 32>}, {pipeline_mode = #tpu.pipeline_mode<synchronous>, transform_indices = @transform_5, window_bounds = array<i64: 1, 32>}, {pipeline_mode = #tpu.pipeline_mode<synchronous>, transform_indices = @transform_6, window_bounds = array<i64: 32, 1>}, {transform_indices = @transform_7, window_bounds = array<i64: 1>}, {transform_indices = @transform_8, window_bounds = array<i64: 16, 256>}, {transform_indices = @transform_9, window_bounds = array<i64: 256, 1>}]} {
    %c0 = arith.constant 0 : index
    %c0_0 = arith.constant 0 : index
    %c0_1 = arith.constant 0 : index
    %0 = vector.load %arg1[%c0, %c0_0, %c0_1] : memref<16x16x32xf32, #tpu.memory_space<vmem>>, vector<16x16x32xf32>
    %1 = arith.truncf %0 : vector<16x16x32xf32> to vector<16x16x32xbf16>
    %c0_2 = arith.constant 0 : index
    %c0_3 = arith.constant 0 : index
    %c0_4 = arith.constant 0 : index
    %2 = vector.load %arg2[%c0_2, %c0_3, %c0_4] : memref<16x16x32xf32, #tpu.memory_space<vmem>>, vector<16x16x32xf32>
    %3 = arith.truncf %2 : vector<16x16x32xf32> to vector<16x16x32xbf16>
    "tpu.trace_start"() <{level = 10 : i32, message = "bnc,bmc->bnm"}> : () -> ()
    %cst = arith.constant dense<0.000000e+00> : vector<16x16x16xf32>
    %4 = tpu.matmul %1, %3, %cst {dimension_numbers = #tpu.dot_dimension_numbers<[2], [2], [1], [1], [0, 0, 0, 1, 1, 1], [0], [0]>} : vector<16x16x32xbf16>, vector<16x16x32xbf16>, vector<16x16x16xf32> -> vector<16x16x16xf32>
    "tpu.trace_stop"() : () -> ()
    %cst_5 = arith.constant 0.176776692 : f32
    %5 = vector.broadcast %cst_5 : f32 to vector<16x16x16xf32>
    %6 = arith.mulf %4, %5 : vector<16x16x16xf32>
    %cst_6 = arith.constant dense<0xFF800000> : vector<16x16xf32>
    %7 = vector.multi_reduction <maximumf>, %6, %cst_6 [2] : vector<16x16x16xf32> to vector<16x16xf32>
    %8 = vector.shape_cast %7 : vector<16x16xf32> to vector<16x16x1xf32>
    %9 = vector.broadcast %8 : vector<16x16x1xf32> to vector<16x16x16xf32>
    %10 = arith.subf %6, %9 : vector<16x16x16xf32>
    %11 = math.exp %10 : vector<16x16x16xf32>
    %cst_7 = arith.constant dense<0.000000e+00> : vector<16x16xf32>
    %12 = vector.multi_reduction <add>, %11, %cst_7 [2] : vector<16x16x16xf32> to vector<16x16xf32>
    %13 = vector.shape_cast %12 : vector<16x16xf32> to vector<16x16x1xf32>
    %14 = tpu.reciprocal %13 : vector<16x16x1xf32> -> vector<16x16x1xf32>
    %15 = vector.broadcast %14 : vector<16x16x1xf32> to vector<16x16x16xf32>
    %16 = arith.mulf %11, %15 : vector<16x16x16xf32>
    %17 = vector.shape_cast %16 : vector<16x16x16xf32> to vector<16x256xf32>
    %c0_8 = arith.constant 0 : index
    %c0_9 = arith.constant 0 : index
    %18 = vector.load %arg9[%c0_8, %c0_9] : memref<16x256xf32, #tpu.memory_space<vmem>>, vector<16x256xf32>
    tpu.vector_store %arg9[%c0_8, %c0_9], %17 {strides = array<i32>} : memref<16x256xf32, #tpu.memory_space<vmem>>, vector<16x256xf32>,
    %19 = arith.truncf %16 : vector<16x16x16xf32> to vector<16x16x16xbf16>
    "tpu.trace_start"() <{level = 10 : i32, message = "bnm,bmc->bnc"}> : () -> ()
    %cst_10 = arith.constant dense<0.000000e+00> : vector<16x16x32xf32>
    %20 = tpu.matmul %19, %3, %cst_10 {dimension_numbers = #tpu.dot_dimension_numbers<[2], [1], [1], [2], [0, 0, 0, 1, 1, 2], [0], [0]>} : vector<16x16x16xbf16>, vector<16x16x32xbf16>, vector<16x16x32xf32> -> vector<16x16x32xf32>
    "tpu.trace_stop"() : () -> ()
    %21 = vector.shape_cast %1 : vector<16x16x32xbf16> to vector<256x32xbf16>
    %22 = arith.truncf %20 : vector<16x16x32xf32> to vector<16x16x32xbf16>
    %23 = vector.shape_cast %22 : vector<16x16x32xbf16> to vector<256x32xbf16>
    %24 = tpu.concatenate %21, %23 in 1 : vector<256x32xbf16>, vector<256x32xbf16> -> vector<256x64xbf16>
    %c0_11 = arith.constant 0 : index
    %c0_12 = arith.constant 0 : index
    %25 = vector.load %arg3[%c0_11, %c0_12] : memref<64x64xbf16, #tpu.memory_space<vmem>>, vector<64x64xbf16>
    %cst_13 = arith.constant dense<0.000000e+00> : vector<256x64xf32>
    %26 = tpu.matmul %24, %25, %cst_13 {dimension_numbers = #tpu.dot_dimension_numbers<[1], [0], [0], [1], [0, 0, 1, 1], [], []>} : vector<256x64xbf16>, vector<64x64xbf16>, vector<256x64xf32> -> vector<256x64xf32>
    %c0_14 = arith.constant 0 : index
    %c0_15 = arith.constant 0 : index
    %27 = vector.load %arg4[%c0_14, %c0_15] : memref<1x64xf32, #tpu.memory_space<vmem>>, vector<1x64xf32>
    %28 = vector.broadcast %27 : vector<1x64xf32> to vector<256x64xf32>
    %29 = arith.addf %26, %28 : vector<256x64xf32>
    %cst_16 = arith.constant 0.000000e+00 : f32
    %30 = vector.broadcast %cst_16 : f32 to vector<256x64xf32>
    %31 = arith.maximumf %29, %30 : vector<256x64xf32>
    %32 = arith.truncf %31 : vector<256x64xf32> to vector<256x64xbf16>
    %c0_17 = arith.constant 0 : index
    %c0_18 = arith.constant 0 : index
    %33 = vector.load %arg5[%c0_17, %c0_18] : memref<64x32xbf16, #tpu.memory_space<vmem>>, vector<64x32xbf16>
    %cst_19 = arith.constant dense<0.000000e+00> : vector<256x32xf32>
    %34 = tpu.matmul %32, %33, %cst_19 {dimension_numbers = #tpu.dot_dimension_numbers<[1], [0], [0], [1], [0, 0, 1, 1], [], []>} : vector<256x64xbf16>, vector<64x32xbf16>, vector<256x32xf32> -> vector<256x32xf32>
    %c0_20 = arith.constant 0 : index
    %c0_21 = arith.constant 0 : index
    %35 = vector.load %arg6[%c0_20, %c0_21] : memref<1x32xf32, #tpu.memory_space<vmem>>, vector<1x32xf32>
    %36 = vector.broadcast %35 : vector<1x32xf32> to vector<256x32xf32>
    %37 = arith.addf %34, %36 : vector<256x32xf32>
    %cst_22 = arith.constant 0.000000e+00 : f32
    %38 = vector.broadcast %cst_22 : f32 to vector<256x32xf32>
    %39 = arith.maximumf %37, %38 : vector<256x32xf32>
    %40 = arith.truncf %39 : vector<256x32xf32> to vector<256x32xbf16>
    %c0_23 = arith.constant 0 : index
    %c0_24 = arith.constant 0 : index
    %41 = vector.load %arg7[%c0_23, %c0_24] : memref<32x1xbf16, #tpu.memory_space<vmem>>, vector<32x1xbf16>
    %cst_25 = arith.constant dense<0.000000e+00> : vector<256x1xf32>
    %42 = tpu.matmul %40, %41, %cst_25 {dimension_numbers = #tpu.dot_dimension_numbers<[1], [0], [0], [1], [0, 0, 1, 1], [], []>} : vector<256x32xbf16>, vector<32x1xbf16>, vector<256x1xf32> -> vector<256x1xf32>
    %c0_26 = arith.constant 0 : index
    %43 = memref.load %arg8[%c0_26] : memref<1xf32, #tpu.memory_space<smem>>
    %44 = vector.broadcast %43 : f32 to vector<256x1xf32>
    %45 = arith.addf %42, %44 : vector<256x1xf32>
    %46 = arith.negf %45 : vector<256x1xf32>
    %47 = math.exp %46 : vector<256x1xf32>
    %cst_27 = arith.constant 1.000000e+00 : f32
    %48 = vector.broadcast %cst_27 : f32 to vector<256x1xf32>
    %49 = arith.addf %48, %47 : vector<256x1xf32>
    %50 = arith.divf %48, %49 : vector<256x1xf32>
    %c0_28 = arith.constant 0 : index
    %c0_29 = arith.constant 0 : index
    %51 = vector.load %arg10[%c0_28, %c0_29] : memref<256x1xf32, #tpu.memory_space<vmem>>, vector<256x1xf32>
    tpu.vector_store %arg10[%c0_28, %c0_29], %50 {strides = array<i32>} : memref<256x1xf32, #tpu.memory_space<vmem>>, vector<256x1xf32>,
    return
  }
  func.func @transform_0(%arg0: i32) -> (i32, i32, i32) {
    %c0_i32 = arith.constant 0 : i32
    %c0_i32_0 = arith.constant 0 : i32
    %c0_i32_1 = arith.constant 0 : i32
    return %arg0, %c0_i32, %c0_i32_0 : i32, i32, i32
  }
  func.func @transform_1(%arg0: i32) -> (i32, i32, i32) {
    %c0_i32 = arith.constant 0 : i32
    %c0_i32_0 = arith.constant 0 : i32
    %c0_i32_1 = arith.constant 0 : i32
    return %arg0, %c0_i32, %c0_i32_0 : i32, i32, i32
  }
  func.func @transform_2(%arg0: i32) -> (i32, i32) {
    %c0_i32 = arith.constant 0 : i32
    %c0_i32_0 = arith.constant 0 : i32
    %c0_i32_1 = arith.constant 0 : i32
    return %c0_i32, %c0_i32_0 : i32, i32
  }
  func.func @transform_3(%arg0: i32) -> (i32, i32) {
    %c0_i32 = arith.constant 0 : i32
    %c0_i32_0 = arith.constant 0 : i32
    %c0_i32_1 = arith.constant 0 : i32
    return %c0_i32, %c0_i32_0 : i32, i32
  }
  func.func @transform_4(%arg0: i32) -> (i32, i32) {
    %c0_i32 = arith.constant 0 : i32
    %c0_i32_0 = arith.constant 0 : i32
    %c0_i32_1 = arith.constant 0 : i32
    return %c0_i32, %c0_i32_0 : i32, i32
  }
  func.func @transform_5(%arg0: i32) -> (i32, i32) {
    %c0_i32 = arith.constant 0 : i32
    %c0_i32_0 = arith.constant 0 : i32
    %c0_i32_1 = arith.constant 0 : i32
    return %c0_i32, %c0_i32_0 : i32, i32
  }
  func.func @transform_6(%arg0: i32) -> (i32, i32) {
    %c0_i32 = arith.constant 0 : i32
    %c0_i32_0 = arith.constant 0 : i32
    %c0_i32_1 = arith.constant 0 : i32
    return %c0_i32, %c0_i32_0 : i32, i32
  }
  func.func @transform_7(%arg0: i32) -> i32 {
    %c0_i32 = arith.constant 0 : i32
    %c0_i32_0 = arith.constant 0 : i32
    return %c0_i32 : i32
  }
  func.func @transform_8(%arg0: i32) -> (i32, i32) {
    %c0_i32 = arith.constant 0 : i32
    %c0_i32_0 = arith.constant 0 : i32
    return %arg0, %c0_i32 : i32, i32
  }
  func.func @transform_9(%arg0: i32) -> (i32, i32) {
    %c0_i32 = arith.constant 0 : i32
    %c0_i32_0 = arith.constant 0 : i32
    return %arg0, %c0_i32 : i32, i32
  }
}

</mosaic_0001>

<bundles_post_ra>
// kernel: tpu_custom_call.1
= control target key start
LH: loop header
LB: loop body
LE: loop exit
PB: predicated region body
PF: predicated region fallthrough
CT: control target
= control target key end

     0   :  { %16 = vsyncpa [#allocation4], 0  ;;  %s6256_s0 = inlined_call_operand.hbm [shape: f32[16,16,32], index: 0, kind: input, shape index: {}]   ;;  %s6257_s1 = inlined_call_operand.hbm [shape: f32[16,16,32], index: 1, kind: input, shape index: {}]   ;;  %s6258_s2 = inlined_call_operand.vmem [shape: bf16[64,64], index: 2, kind: input, shape index: {}]   ;;  %s6259_s3 = inlined_call_operand.vmem [shape: f32[1,64], index: 3, kind: input, shape index: {}]   ;;  %s6260_s4 = inlined_call_operand.vmem [shape: bf16[64,32], index: 4, kind: input, shape index: {}]   ;;  %s6261_s5 = inlined_call_operand.vmem [shape: f32[1,32], index: 5, kind: input, shape index: {}]   ;;  %s6262_s6 = inlined_call_operand.vmem [shape: bf16[32,1], index: 6, kind: input, shape index: {}]   ;;  %s6263_s7 = inlined_call_operand.<no memory space> [shape: f32[1], index: 7, kind: input, shape index: {}]   ;;  %s6264_s8 = inlined_call_operand.hbm [shape: f32[16,256], index: 8, kind: output, shape index: {0}]   ;;  %s6265_s9 = inlined_call_operand.vmem [shape: f32[256,1], index: 9, kind: output, shape index: {1}]  }
   0x1   :  { %17 = vsyncpa [#allocation7], 0 }
   0x2   :  { %18 = vsyncpa [#allocation5], 0  ;;  %s4772_s30 = smov [#allocation3]   ;;  %s4700_s13 = scalar_lea.hbm %s6256_s0, 4096 }
   0x3   :  { %s24_s10 = sshll.u32 %s4772_s30, 4  ;;  %p4701_p0 = scmp.ne.s32.totalorder %s6256_s0, %s4700_s13  ;;  %s25_s10 = int_to_ptr.vmem [resolvable:$true] %s24_s10 }
   0x4   :  { %p4704_p1 = scmp.lt.u32.totalorder %s4700_s13, %s6256_s0 }
   0x6   :  { %p4706_p2 = pnand %p4704_p1, %p4701_p0 }
   0x8   :  { %4709 = shalt.err (!%p4706_p2)
}
   0x9   :  { %s4710_s18 = scalar_lea.vmem %s25_s10, 4096  ;;  %p4715_p4 = scmp.lt.s32.totalorder %s25_s10, %s25_s10 }
   0xa   :  { %p4711_p3 = scmp.ne.s32.totalorder %s25_s10, %s4710_s18  ;;  %p4716_p5 = scmp.lt.s32.totalorder %s4710_s18, %s4710_s18 }
   0xc   :  { %p4717_p6 = por %p4716_p5, %p4715_p4 }
   0xe   :  { %p4718_p7 = pnand %p4717_p6, %p4711_p3 }
  0x10   :  { %4721 = shalt.err (!%p4718_p7)
}
  0x11   :  { %s4773_s19 = smov 128   ;;  %s4774_s20 = smov 8  }
  0x12   :  { %30 = dma.hbm_to_vmem [thread:$0]  %s6256_s0, 4096, %s25_s10, [#allocation4], %s4773_s19, %s4773_s19, %s4774_s20  }
  0x13   :  { %s4775_s23 = smov [#allocation6]   ;;  %s4722_s27 = scalar_lea.hbm %s6257_s1, 4096 }
  0x14   :  { %s36_s24 = sshll.u32 %s4775_s23, 4  ;;  %p4723_p8 = scmp.ne.s32.totalorder %s6257_s1, %s4722_s27  ;;  %s37_s24 = int_to_ptr.vmem [resolvable:$true] %s36_s24 }
  0x15   :  { %p4726_p9 = scmp.lt.u32.totalorder %s4722_s27, %s6257_s1 }
  0x17   :  { %p4728_p10 = pnand %p4726_p9, %p4723_p8 }
  0x19   :  { %4731 = shalt.err (!%p4728_p10)
}
  0x1a   :  { %s4732_s12 = scalar_lea.vmem %s37_s24, 4096  ;;  %p4737_p12 = scmp.lt.s32.totalorder %s37_s24, %s37_s24 }
  0x1b   :  { %p4733_p11 = scmp.ne.s32.totalorder %s37_s24, %s4732_s12  ;;  %p4738_p13 = scmp.lt.s32.totalorder %s4732_s12, %s4732_s12 }
  0x1d   :  { %p4739_p0 = por %p4738_p13, %p4737_p12 }
  0x1f   :  { %p4740_p1 = pnand %p4739_p0, %p4733_p11 }
  0x21   :  { %4743 = shalt.err (!%p4740_p1)
}
  0x22   :  { %42 = dma.hbm_to_vmem [thread:$0]  %s6257_s1, 4096, %s37_s24, [#allocation7], %s4773_s19, %s4773_s19, %s4774_s20  }
  0x23   :  { %4766 = dma.done.wait [#allocation4], 4096  }
  0x24   :  { %4767 = vsyncadd [#allocation4], 4294963200 }
  0x25   :  { %4768 = dma.done.wait [#allocation7], 4096  }
  0x26   :  { %4769 = vsyncadd [#allocation7], 4294963200  ;;  %v6266_v0 = vmov 0.0   ;;  %vm4777_vm0 = vmmov 0   ;;  %v110_v1 = vld [vmem:[#allocation6] sm:$0xff]  ;;  %v111_v2 = vld [vmem:[#allocation6 + $0x8] sm:$0xff] }
  0x27   :  { %4101 = vmatprep.subr.bf16.mxu0 %v6266_v0  ;;  %4107 = vmatprep.subr.bf16.mxu1 %v6266_v0  ;;  %vm158_vm1 = vcmask 261120   ;;  %v112_v3 = vld [vmem:[#allocation6 + $0x10] sm:$0xff]  ;;  %v4869_v4 = vpack.c.bf16 %v111_v2, %v110_v1  ;;  %v113_v5 = vld [vmem:[#allocation6 + $0x18] sm:$0xff]  ;;  %v114_v7 = vld [vmem:[#allocation6 + $0x20] sm:$0xff]  ;;  %vm943_vm2 = vcmask 130048   ;;  %s4780_s20 = smov 32  }
  0x28   :  { %4103 = vmatprep.mubr.msk.bf16.mxu0 %vm4777_vm0, %v6266_v0  ;;  %4109 = vmatprep.mubr.msk.bf16.mxu1 %vm4777_vm0, %v6266_v0  ;;  %v4871_v6 = vpack.c.bf16 %v113_v5, %v112_v3  ;;  %v115_v9 = vld [vmem:[#allocation6 + $0x28] sm:$0xff]  ;;  %v116_v10 = vld [vmem:[#allocation6 + $0x30] sm:$0xff]  ;;  %v117_v11 = vld [vmem:[#allocation6 + $0x38] sm:$0xff]  ;;  %s4782_s21 = smov 48   ;;  %s4783_s22 = smov 64   ;;  %vm1959_vm3 = vcmask 523264  }
  0x29   :  { %v163_v8 = vsel %vm158_vm1, %v4869_v4, 0  ;;  %v62_v13 = vld [vmem:[#allocation3] sm:$0xff]  ;;  %v63_v14 = vld [vmem:[#allocation3 + $0x8] sm:$0xff]  ;;  %v64_v15 = vld [vmem:[#allocation3 + $0x10] sm:$0xff]  ;;  %v4878_v17 = vpack.c.bf16 %v115_v9, %v114_v7  ;;  %v4881_v18 = vpack.c.bf16 %v117_v11, %v116_v10  ;;  %s4784_s23 = smov 80   ;;  %s4785_s24 = smov 96  }
  0x2a   :  { %4102 = vmatpush3.bf16.xpose.msra.mxu0 %v163_v8  ;;  %v210_v12 = vsel %vm158_vm1, %v4871_v6, 0  ;;  %v65_v16 = vld [vmem:[#allocation3 + $0x18] sm:$0xff]  ;;  %v4883_v19 = vpack.c.bf16 %v63_v14, %v62_v13  ;;  %v118_v23 = vld [vmem:[#allocation6 + $0x40] sm:$0xff]  ;;  %v119_v24 = vld [vmem:[#allocation6 + $0x48] sm:$0xff]  ;;  %s4786_s27 = smov 112   ;;  %vm1956_vm4 = vcmask 392192  }
  0x2b   :  { %4108 = vmatpush3.bf16.xpose.msra.mxu1 %v210_v12  ;;  %4113 = vmatprep.subr.bf16.mxu0 %v6266_v0  ;;  %v4885_v20 = vpack.c.bf16 %v65_v16, %v64_v15  ;;  %v257_v21 = vsel %vm158_vm1, %v4878_v17, 0  ;;  %v304_v22 = vsel %vm158_vm1, %v4881_v18, 0  ;;  %v120_v25 = vld [vmem:[#allocation6 + $0x50] sm:$0xff]  ;;  %v121_v26 = vld [vmem:[#allocation6 + $0x58] sm:$0xff]  ;;  %v66_v27 = vld [vmem:[#allocation3 + $0x20] sm:$0xff]  ;;  %v4897_v29 = vpack.c.bf16 %v119_v24, %v118_v23 }
  0x2c   :  { %4119 = vmatprep.subr.bf16.mxu1 %v6266_v0  ;;  %6284 = vst [vmem:[#allocation12_spill] sm:$0xff] %v4883_v19  ;;  %v67_v28 = vld [vmem:[#allocation3 + $0x28] sm:$0xff]  ;;  %v68_v30 = vld [vmem:[#allocation3 + $0x30] sm:$0xff]  ;;  %v69_v31 = vld [vmem:[#allocation3 + $0x38] sm:$0xff]  ;;  %v4902_v32 = vpack.c.bf16 %v121_v26, %v120_v25  ;;  %vm1962_vm5 = vcmask 654336   ;;  %vm1965_vm6 = vcmask 785408  }
  0x2d   :  { %6285 = vst [vmem:[#allocation13_spill] sm:$0xff] %v4885_v20  ;;  %v122_v33 = vld [vmem:[#allocation6 + $0x60] sm:$0xff]  ;;  %v4904_v34 = vpack.c.bf16 %v67_v28, %v66_v27  ;;  %v123_v35 = vld [vmem:[#allocation6 + $0x68] sm:$0xff]  ;;  %v124_v36 = vld [vmem:[#allocation6 + $0x70] sm:$0xff]  ;;  %v4907_v38 = vpack.c.bf16 %v69_v31, %v68_v30  ;;  %v351_v39 = vsel %vm158_vm1, %v4897_v29, 0  ;;  %vm1968_vm7 = vcmask 916480  }
  0x2e   :  { %v125_v37 = vld [vmem:[#allocation6 + $0x78] sm:$0xff]  ;;  %v398_v40 = vsel %vm158_vm1, %v4902_v32, 0  ;;  %v4913_v41 = vpack.c.bf16 %v123_v35, %v122_v33  ;;  %v70_v43 = vld [vmem:[#allocation3 + $0x40] sm:$0xff]  ;;  %v71_v44 = vld [vmem:[#allocation3 + $0x48] sm:$0xff] }
  0x2f   :  { %6286 = vst [vmem:[#allocation14_spill] sm:$0xff] %v4904_v34  ;;  %6287 = vst [vmem:[#allocation15_spill] sm:$0xff] %v4907_v38  ;;  %v4915_v42 = vpack.c.bf16 %v125_v37, %v124_v36  ;;  %v72_v45 = vld [vmem:[#allocation3 + $0x50] sm:$0xff]  ;;  %v73_v46 = vld [vmem:[#allocation3 + $0x58] sm:$0xff]  ;;  %v4930_v49 = vpack.c.bf16 %v71_v44, %v70_v43 }
  0x30   :  { %v445_v47 = vsel %vm158_vm1, %v4913_v41, 0  ;;  %v4933_v50 = vpack.c.bf16 %v73_v46, %v72_v45  ;;  %v126_v51 = vld [vmem:[#allocation6 + $0x80] sm:$0xff]  ;;  %v127_v52 = vld [vmem:[#allocation6 + $0x88] sm:$0xff]  ;;  %v128_v53 = vld [vmem:[#allocation6 + $0x90] sm:$0xff] }
  0x31   :  { %4104 = vmatmul.mubr.msk.bf16.vlgmr.msra.gmra.mrb[0].mxu0 %vm158_vm1, %v4883_v19  ;;  %v492_v48 = vsel %vm158_vm1, %v4915_v42, 0  ;;  %6288 = vst [vmem:[#allocation16_spill] sm:$0xff] %v4930_v49  ;;  %v129_v54 = vld [vmem:[#allocation6 + $0x98] sm:$0xff]  ;;  %v74_v55 = vld [vmem:[#allocation3 + $0x60] sm:$0xff]  ;;  %v75_v56 = vld [vmem:[#allocation3 + $0x68] sm:$0xff]  ;;  %v4941_v57 = vpack.c.bf16 %v127_v52, %v126_v51 }
  0x32   :  { %4110 = vmatmul.mubr.msk.bf16.vlgmr.msra.gmra.mrb[0].mxu1 %vm158_vm1, %v4885_v20  ;;  %4114 = vmatpush3.bf16.xpose.msra.mxu0 %v257_v21  ;;  %6289 = vst [vmem:[#allocation17_spill] sm:$0xff] %v4933_v50  ;;  %v76_v58 = vld [vmem:[#allocation3 + $0x70] sm:$0xff]  ;;  %v77_v59 = vld [vmem:[#allocation3 + $0x78] sm:$0xff]  ;;  %v4946_v60 = vpack.c.bf16 %v129_v54, %v128_v53  ;;  %v4948_v61 = vpack.c.bf16 %v75_v56, %v74_v55  ;;  %v130_v2 = vld [vmem:[#allocation6 + $0xa0] sm:$0xff] }
  0x33   :  { %4120 = vmatpush3.bf16.xpose.msra.mxu1 %v304_v22  ;;  %4115 = vmatprep.mubr.msk.bf16.mxu0 %vm4777_vm0, %v6266_v0  ;;  %v4951_v62 = vpack.c.bf16 %v77_v59, %v76_v58  ;;  %v539_v63 = vsel %vm158_vm1, %v4941_v57, 0  ;;  %v131_v3 = vld [vmem:[#allocation6 + $0xa8] sm:$0xff]  ;;  %v132_v5 = vld [vmem:[#allocation6 + $0xb0] sm:$0xff]  ;;  %v133_v7 = vld [vmem:[#allocation6 + $0xb8] sm:$0xff] }
  0x34   :  { %4125 = vmatprep.subr.bf16.mxu0 %v6266_v0  ;;  %4121 = vmatprep.mubr.msk.bf16.mxu1 %vm4777_vm0, %v6266_v0  ;;  %6290 = vst [vmem:[#allocation18_spill] sm:$0xff] %v4948_v61  ;;  %v586_v1 = vsel %vm158_vm1, %v4946_v60, 0  ;;  %v78_v8 = vld [vmem:[#allocation3 + $0x80] sm:$0xff]  ;;  %v79_v9 = vld [vmem:[#allocation3 + $0x88] sm:$0xff]  ;;  %v4963_v10 = vpack.c.bf16 %v131_v3, %v130_v2  ;;  %v80_v11 = vld [vmem:[#allocation3 + $0x90] sm:$0xff]  ;;  %v4968_v13 = vpack.c.bf16 %v133_v7, %v132_v5 }
  0x35   :  { %4131 = vmatprep.subr.bf16.mxu1 %v6266_v0  ;;  %6291 = vst [vmem:[#allocation19_spill] sm:$0xff] %v4951_v62  ;;  %v81_v12 = vld [vmem:[#allocation3 + $0x98] sm:$0xff]  ;;  %v4970_v14 = vpack.c.bf16 %v79_v9, %v78_v8  ;;  %v134_v22 = vld [vmem:[#allocation6 + $0xc0] sm:$0xff]  ;;  %v135_v23 = vld [vmem:[#allocation6 + $0xc8] sm:$0xff] }
  0x36   :  { %v4973_v15 = vpack.c.bf16 %v81_v12, %v80_v11  ;;  %v633_v16 = vsel %vm158_vm1, %v4963_v10, 0  ;;  %v680_v21 = vsel %vm158_vm1, %v4968_v13, 0  ;;  %v136_v24 = vld [vmem:[#allocation6 + $0xd0] sm:$0xff]  ;;  %v137_v25 = vld [vmem:[#allocation6 + $0xd8] sm:$0xff]  ;;  %v82_v26 = vld [vmem:[#allocation3 + $0xa0] sm:$0xff]  ;;  %v4985_v28 = vpack.c.bf16 %v135_v23, %v134_v22 }
  0x37   :  { %6292 = vst [vmem:[#allocation20_spill] sm:$0xff] %v4970_v14  ;;  %v83_v27 = vld [vmem:[#allocation3 + $0xa8] sm:$0xff]  ;;  %v84_v30 = vld [vmem:[#allocation3 + $0xb0] sm:$0xff]  ;;  %v85_v31 = vld [vmem:[#allocation3 + $0xb8] sm:$0xff]  ;;  %v4990_v33 = vpack.c.bf16 %v137_v25, %v136_v24 }
  0x38   :  { %6293 = vst [vmem:[#allocation21_spill] sm:$0xff] %v4973_v15  ;;  %v4992_v35 = vpack.c.bf16 %v83_v27, %v82_v26  ;;  %v4995_v36 = vpack.c.bf16 %v85_v31, %v84_v30  ;;  %v727_v37 = vsel %vm158_vm1, %v4985_v28, 0  ;;  %v139_v43 = vld [vmem:[#allocation6 + $0xe8] sm:$0xff]  ;;  %v140_v44 = vld [vmem:[#allocation6 + $0xf0] sm:$0xff]  ;;  %v141_v45 = vld [vmem:[#allocation6 + $0xf8] sm:$0xff] }
  0x39   :  { %4116 = vmatmul.mubr.msk.bf16.vlgmr.msra.gmra.mrb[4].mxu0 %vm158_vm1, %v4904_v34  ;;  %v86_v46 = vld [vmem:[#allocation3 + $0xc0] sm:$0xff]  ;;  %v88_v51 = vld [vmem:[#allocation3 + $0xd0] sm:$0xff]  ;;  %v89_v52 = vld [vmem:[#allocation3 + $0xd8] sm:$0xff]  ;;  %v5012_v53 = vpack.c.bf16 %v141_v45, %v140_v44 }
  0x3a   :  { %4126 = vmatpush3.bf16.xpose.msra.mxu0 %v351_v39  ;;  %4122 = vmatmul.mubr.msk.bf16.vlgmr.msra.gmra.mrb[4].mxu1 %vm158_vm1, %v4907_v38  ;;  %6294 = vst [vmem:[#allocation22_spill] sm:$0xff] %v4992_v35  ;;  %6295 = vst [vmem:[#allocation23_spill] sm:$0xff] %v4995_v36  ;;  %v774_v39 = vsel %vm158_vm1, %v4990_v33, 0  ;;  %v5017_v55 = vpack.c.bf16 %v89_v52, %v88_v51  ;;  %v90_v59 = vld [vmem:[#allocation3 + $0xe0] sm:$0xff]  ;;  %v93_v2 = vld [vmem:[#allocation3 + $0xf8] sm:$0xff] }
  0x3b   :  { %4132 = vmatpush3.bf16.xpose.msra.mxu1 %v398_v40  ;;  %4127 = vmatprep.mubr.msk.bf16.mxu0 %vm4777_vm0, %v6266_v0  ;;  %v138_v40 = vld [vmem:[#allocation6 + $0xe0] sm:$0xff]  ;;  %v868_v58 = vsel %vm158_vm1, %v5012_v53, 0 }
  0x3c   :  { %4137 = vmatprep.subr.bf16.mxu0 %v6266_v0  ;;  %4133 = vmatprep.mubr.msk.bf16.mxu1 %vm4777_vm0, %v6266_v0  ;;  %6297 = vst [vmem:[#allocation25_spill] sm:$0xff] %v5017_v55 }
  0x3d   :  { %4143 = vmatprep.subr.bf16.mxu1 %v6266_v0 }
  0x41   :  { %4128 = vmatmul.mubr.msk.bf16.vlgmr.msra.gmra.mrb[8].mxu0 %vm158_vm1, %v4930_v49 }
  0x42   :  { %4138 = vmatpush3.bf16.xpose.msra.mxu0 %v445_v47  ;;  %4134 = vmatmul.mubr.msk.bf16.vlgmr.msra.gmra.mrb[8].mxu1 %vm158_vm1, %v4933_v50  ;;  %v87_v47 = vld [vmem:[#allocation3 + $0xc8] sm:$0xff] }
  0x43   :  { %4144 = vmatpush3.bf16.xpose.msra.mxu1 %v492_v48  ;;  %4139 = vmatprep.mubr.msk.bf16.mxu0 %vm4777_vm0, %v6266_v0  ;;  %v5007_v48 = vpack.c.bf16 %v139_v43, %v138_v40  ;;  %v5014_v54 = vpack.c.bf16 %v87_v47, %v86_v46 }
  0x44   :  { %4149 = vmatprep.subr.bf16.mxu0 %v6266_v0  ;;  %4145 = vmatprep.mubr.msk.bf16.mxu1 %vm4777_vm0, %v6266_v0 }
  0x45   :  { %4155 = vmatprep.subr.bf16.mxu1 %v6266_v0  ;;  %6296 = vst [vmem:[#allocation24_spill] sm:$0xff] %v5014_v54  ;;  %v821_v56 = vsel %vm158_vm1, %v5007_v48, 0 }
  0x49   :  { %4140 = vmatmul.mubr.msk.bf16.vlgmr.msra.gmra.mrb[12].mxu0 %vm158_vm1, %v4948_v61 }
  0x4a   :  { %4150 = vmatpush3.bf16.xpose.msra.mxu0 %v539_v63  ;;  %4146 = vmatmul.mubr.msk.bf16.vlgmr.msra.gmra.mrb[12].mxu1 %vm158_vm1, %v4951_v62  ;;  %v91_v63 = vld [vmem:[#allocation3 + $0xe8] sm:$0xff] }
  0x4b   :  { %4156 = vmatpush3.bf16.xpose.msra.mxu1 %v586_v1  ;;  %4151 = vmatprep.mubr.msk.bf16.mxu0 %vm4777_vm0, %v6266_v0  ;;  %v92_v1 = vld [vmem:[#allocation3 + $0xf0] sm:$0xff]  ;;  %v5032_v3 = vpack.c.bf16 %v91_v63, %v90_v59 }
  0x4c   :  { %4161 = vmatprep.subr.bf16.mxu0 %v6266_v0  ;;  %4157 = vmatprep.mubr.msk.bf16.mxu1 %vm4777_vm0, %v6266_v0  ;;  %v5035_v5 = vpack.c.bf16 %v93_v2, %v92_v1 }
  0x4d   :  { %4167 = vmatprep.subr.bf16.mxu1 %v6266_v0  ;;  %6298 = vst [vmem:[#allocation26_spill] sm:$0xff] %v5032_v3 }
  0x4e   :  { %6299 = vst [vmem:[#allocation27_spill] sm:$0xff] %v5035_v5 }
  0x51   :  { %4152 = vmatmul.mubr.msk.bf16.vlgmr.msra.gmra.mrb[16].mxu0 %vm158_vm1, %v4970_v14 }
  0x52   :  { %4162 = vmatpush3.bf16.xpose.msra.mxu0 %v633_v16  ;;  %4158 = vmatmul.mubr.msk.bf16.vlgmr.msra.gmra.mrb[16].mxu1 %vm158_vm1, %v4973_v15 }
  0x53   :  { %4168 = vmatpush3.bf16.xpose.msra.mxu1 %v680_v21  ;;  %4163 = vmatprep.mubr.msk.bf16.mxu0 %vm4777_vm0, %v6266_v0 }
  0x54   :  { %4173 = vmatprep.subr.bf16.mxu0 %v6266_v0  ;;  %4169 = vmatprep.mubr.msk.bf16.mxu1 %vm4777_vm0, %v6266_v0 }
  0x55   :  { %4179 = vmatprep.subr.bf16.mxu1 %v6266_v0 }
  0x59   :  { %4164 = vmatmul.mubr.msk.bf16.vlgmr.msra.gmra.mrb[20].mxu0 %vm158_vm1, %v4992_v35 }
  0x5a   :  { %4174 = vmatpush3.bf16.xpose.msra.mxu0 %v727_v37  ;;  %4170 = vmatmul.mubr.msk.bf16.vlgmr.msra.gmra.mrb[20].mxu1 %vm158_vm1, %v4995_v36 }
  0x5b   :  { %4180 = vmatpush3.bf16.xpose.msra.mxu1 %v774_v39  ;;  %4175 = vmatprep.mubr.msk.bf16.mxu0 %vm4777_vm0, %v6266_v0 }
  0x5c   :  { %4185 = vmatprep.subr.bf16.mxu0 %v6266_v0  ;;  %4181 = vmatprep.mubr.msk.bf16.mxu1 %vm4777_vm0, %v6266_v0 }
  0x5d   :  { %4191 = vmatprep.subr.bf16.mxu1 %v6266_v0 }
  0x61   :  { %4176 = vmatmul.mubr.msk.bf16.vlgmr.msra.gmra.mrb[24].mxu0 %vm158_vm1, %v5014_v54 }
  0x62   :  { %4186 = vmatpush3.bf16.xpose.msra.mxu0 %v821_v56  ;;  %4182 = vmatmul.mubr.msk.bf16.vlgmr.msra.gmra.mrb[24].mxu1 %vm158_vm1, %v5017_v55 }
  0x63   :  { %4192 = vmatpush3.bf16.xpose.msra.mxu1 %v868_v58  ;;  %4187 = vmatprep.mubr.msk.bf16.mxu0 %vm4777_vm0, %v6266_v0 }
  0x64   :  { %4193 = vmatprep.mubr.msk.bf16.mxu1 %vm4777_vm0, %v6266_v0  ;;  %4197 = vmatprep.subr.bf16.mxu0 %v6266_v0 }
  0x65   :  { %4203 = vmatprep.subr.bf16.mxu1 %v6266_v0 }
  0x69   :  { %4188 = vmatmul.mubr.msk.bf16.vlgmr.msra.gmra.mrb[28].mxu0 %vm158_vm1, %v5032_v3 }
  0x6a   :  { %4194 = vmatmul.mubr.msk.bf16.vlgmr.msra.gmra.mrb[28].mxu1 %vm158_vm1, %v5035_v5  ;;  %4198 = vmatpush3.bf16.msra.mxu0 %v4869_v4 }
  0x6b   :  { %4204 = vmatpush3.bf16.msra.mxu1 %v4871_v6  ;;  %4199 = vmatprep.mubr.msk.bf16.mxu0 %vm4777_vm0, %v6266_v0 }
  0x6c   :  { %4209 = vmatprep.subr.bf16.mxu0 %v6266_v0  ;;  %4205 = vmatprep.mubr.msk.bf16.mxu1 %vm4777_vm0, %v6266_v0 }
  0x6d   :  { %4215 = vmatprep.subr.bf16.mxu1 %v6266_v0 }
 0x104   :  { %v199_v7 = vpop.f32.mrb[0].mxu0 }
 0x105   :  { %v5049_v8 = vmul.f32 0.17677669, %v199_v7  ;;  %v246_v9 = vpop.f32.mrb[0].mxu1  ;;  %v4105_v11 = vpop.f32.mrb[1].mxu0 }
 0x106   :  { %v5051_v12 = vmul.f32 0.17677669, %v246_v9  ;;  %v202_v4 = vpop.f32.mrb[2].mxu0  ;;  %v4111_v6 = vpop.f32.mrb[1].mxu1 }
 0x107   :  { %v5053_v16 = vmul.f32 0.17677669, %v202_v4  ;;  %v4106_v21 = vpop.f32.mrb[3].mxu0  ;;  %v249_v22 = vpop.f32.mrb[2].mxu1  ;;  %v944_v23 = vsel %vm943_vm2, %v5049_v8, -inf }
 0x108   :  { %v5057_v24 = vmul.f32 0.17677669, %v249_v22  ;;  %v950_v25 = vsel %vm943_vm2, %v5051_v12, -inf  ;;  %v4112_v26 = vpop.f32.mrb[3].mxu1  ;;  %945 = vmax.xlane.f32.xlu0 %v944_v23 }
 0x109   :  { %951 = vmax.xlane.f32.xlu1 %v950_v25  ;;  %v947_v30 = vsel %vm943_vm2, %v5053_v16, -inf }
 0x10a   :  { %v953_v27 = vsel %vm943_vm2, %v5057_v24, -inf }
 0x10c   :  { %948 = vmax.xlane.f32.xlu0 %v947_v30  ;;  %v293_v31 = vpop.f32.mrb[4].mxu0 }
 0x10d   :  { %954 = vmax.xlane.f32.xlu1 %v953_v27  ;;  %v5065_v37 = vmul.f32 0.17677669, %v293_v31  ;;  %v4117_v39 = vpop.f32.mrb[5].mxu0  ;;  %v340_v40 = vpop.f32.mrb[4].mxu1 }
 0x10e   :  { %v296_v43 = vpop.f32.mrb[6].mxu0  ;;  %v5067_v44 = vmul.f32 0.17677669, %v340_v40  ;;  %v4123_v45 = vpop.f32.mrb[5].mxu1 }
 0x10f   :  { %v5069_v46 = vmul.f32 0.17677669, %v296_v43  ;;  %v4118_v47 = vpop.f32.mrb[7].mxu0  ;;  %v956_v51 = vsel %vm943_vm2, %v5065_v37, -inf  ;;  %v343_v52 = vpop.f32.mrb[6].mxu1 }
 0x110   :  { %957 = vmax.xlane.f32.xlu0 %v956_v51  ;;  %v5073_v56 = vmul.f32 0.17677669, %v343_v52  ;;  %v4124_v58 = vpop.f32.mrb[7].mxu1  ;;  %v962_v63 = vsel %vm943_vm2, %v5067_v44, -inf }
 0x111   :  { %v959_v59 = vsel %vm943_vm2, %v5069_v46, -inf }
 0x112   :  { %960 = vmax.xlane.f32.xlu1 %v959_v59  ;;  %v965_v1 = vsel %vm943_vm2, %v5073_v56, -inf }
 0x114   :  { %963 = vmax.xlane.f32.xlu0 %v962_v63  ;;  %v387_v2 = vpop.f32.mrb[8].mxu0 }
 0x115   :  { %v5081_v7 = vmul.f32 0.17677669, %v387_v2  ;;  %v4129_v9 = vpop.f32.mrb[9].mxu0  ;;  %v434_v11 = vpop.f32.mrb[8].mxu1 }
 0x116   :  { %966 = vmax.xlane.f32.xlu1 %v965_v1  ;;  %v390_v4 = vpop.f32.mrb[10].mxu0  ;;  %v5083_v6 = vmul.f32 0.17677669, %v434_v11  ;;  %v4135_v21 = vpop.f32.mrb[9].mxu1 }
 0x117   :  { %v5085_v22 = vmul.f32 0.17677669, %v390_v4  ;;  %v4130_v23 = vpop.f32.mrb[11].mxu0  ;;  %v968_v25 = vsel %vm943_vm2, %v5081_v7, -inf  ;;  %v437_v26 = vpop.f32.mrb[10].mxu1 }
 0x118   :  { %969 = vmax.xlane.f32.xlu0 %v968_v25  ;;  %v5089_v27 = vmul.f32 0.17677669, %v437_v26  ;;  %v4136_v30 = vpop.f32.mrb[11].mxu1  ;;  %v974_v39 = vsel %vm943_vm2, %v5083_v6, -inf }
 0x119   :  { %v971_v31 = vsel %vm943_vm2, %v5085_v22, -inf }
 0x11a   :  { %972 = vmax.xlane.f32.xlu1 %v971_v31  ;;  %v977_v40 = vsel %vm943_vm2, %v5089_v27, -inf }
 0x11c   :  { %975 = vmax.xlane.f32.xlu0 %v974_v39  ;;  %v481_v43 = vpop.f32.mrb[12].mxu0 }
 0x11d   :  { %v5097_v45 = vmul.f32 0.17677669, %v481_v43  ;;  %v4141_v47 = vpop.f32.mrb[13].mxu0  ;;  %v528_v51 = vpop.f32.mrb[12].mxu1 }
 0x11e   :  { %978 = vmax.xlane.f32.xlu1 %v977_v40  ;;  %v484_v52 = vpop.f32.mrb[14].mxu0  ;;  %v5099_v58 = vmul.f32 0.17677669, %v528_v51  ;;  %v4147_v59 = vpop.f32.mrb[13].mxu1 }
 0x11f   :  { %v5101_v63 = vmul.f32 0.17677669, %v484_v52  ;;  %v4142_v1 = vpop.f32.mrb[15].mxu0  ;;  %v980_v2 = vsel %vm943_vm2, %v5097_v45, -inf  ;;  %v531_v9 = vpop.f32.mrb[14].mxu1 }
 0x120   :  { %981 = vmax.xlane.f32.xlu0 %v980_v2  ;;  %v5105_v11 = vmul.f32 0.17677669, %v531_v9  ;;  %v4148_v4 = vpop.f32.mrb[15].mxu1  ;;  %v986_v23 = vsel %vm943_vm2, %v5099_v58, -inf }
 0x121   :  { %v983_v21 = vsel %vm943_vm2, %v5101_v63, -inf }
 0x122   :  { %984 = vmax.xlane.f32.xlu1 %v983_v21  ;;  %v989_v25 = vsel %vm943_vm2, %v5105_v11, -inf }
 0x124   :  { %987 = vmax.xlane.f32.xlu0 %v986_v23  ;;  %v575_v26 = vpop.f32.mrb[16].mxu0 }
 0x125   :  { %v5113_v30 = vmul.f32 0.17677669, %v575_v26  ;;  %v4153_v31 = vpop.f32.mrb[17].mxu0  ;;  %v622_v39 = vpop.f32.mrb[16].mxu1 }
 0x126   :  { %990 = vmax.xlane.f32.xlu1 %v989_v25  ;;  %v578_v40 = vpop.f32.mrb[18].mxu0  ;;  %v5115_v43 = vmul.f32 0.17677669, %v622_v39  ;;  %v4159_v47 = vpop.f32.mrb[17].mxu1 }
 0x127   :  { %v5117_v51 = vmul.f32 0.17677669, %v578_v40  ;;  %v4154_v52 = vpop.f32.mrb[19].mxu0  ;;  %v992_v59 = vsel %vm943_vm2, %v5113_v30, -inf  ;;  %v625_v1 = vpop.f32.mrb[18].mxu1 }
 0x128   :  { %993 = vmax.xlane.f32.xlu0 %v992_v59  ;;  %v5121_v2 = vmul.f32 0.17677669, %v625_v1  ;;  %v4160_v9 = vpop.f32.mrb[19].mxu1  ;;  %v998_v21 = vsel %vm943_vm2, %v5115_v43, -inf }
 0x129   :  { %v995_v4 = vsel %vm943_vm2, %v5117_v51, -inf }
 0x12a   :  { %996 = vmax.xlane.f32.xlu1 %v995_v4  ;;  %v1001_v23 = vsel %vm943_vm2, %v5121_v2, -inf }
 0x12c   :  { %999 = vmax.xlane.f32.xlu0 %v998_v21  ;;  %v669_v25 = vpop.f32.mrb[20].mxu0 }
 0x12d   :  { %v5129_v26 = vmul.f32 0.17677669, %v669_v25  ;;  %v4165_v31 = vpop.f32.mrb[21].mxu0  ;;  %v716_v39 = vpop.f32.mrb[20].mxu1 }
 0x12e   :  { %1002 = vmax.xlane.f32.xlu1 %v1001_v23  ;;  %v672_v40 = vpop.f32.mrb[22].mxu0  ;;  %v5131_v47 = vmul.f32 0.17677669, %v716_v39  ;;  %v4171_v52 = vpop.f32.mrb[21].mxu1 }
 0x12f   :  { %v5133_v59 = vmul.f32 0.17677669, %v672_v40  ;;  %v4166_v1 = vpop.f32.mrb[23].mxu0  ;;  %v1004_v9 = vsel %vm943_vm2, %v5129_v26, -inf  ;;  %v719_v4 = vpop.f32.mrb[22].mxu1 }
 0x130   :  { %1005 = vmax.xlane.f32.xlu0 %v1004_v9  ;;  %v5137_v0 = vmul.f32 0.17677669, %v719_v4  ;;  %v4172_v21 = vpop.f32.mrb[23].mxu1  ;;  %v1010_v23 = vsel %vm943_vm2, %v5131_v47, -inf }
 0x131   :  { %v1007_v25 = vsel %vm943_vm2, %v5133_v59, -inf }
 0x132   :  { %1008 = vmax.xlane.f32.xlu1 %v1007_v25  ;;  %v1013_v31 = vsel %vm943_vm2, %v5137_v0, -inf }
 0x134   :  { %1011 = vmax.xlane.f32.xlu0 %v1010_v23  ;;  %v763_v39 = vpop.f32.mrb[24].mxu0 }
 0x135   :  { %v5145_v40 = vmul.f32 0.17677669, %v763_v39  ;;  %v4177_v52 = vpop.f32.mrb[25].mxu0  ;;  %v810_v1 = vpop.f32.mrb[24].mxu1 }
 0x136   :  { %1014 = vmax.xlane.f32.xlu1 %v1013_v31  ;;  %v766_v9 = vpop.f32.mrb[26].mxu0  ;;  %v5147_v4 = vmul.f32 0.17677669, %v810_v1  ;;  %v4183_v21 = vpop.f32.mrb[25].mxu1 }
 0x137   :  { %v5149_v5 = vmul.f32 0.17677669, %v766_v9  ;;  %v4178_v3 = vpop.f32.mrb[27].mxu0  ;;  %v1016_v25 = vsel %vm943_vm2, %v5145_v40, -inf  ;;  %v813_v55 = vpop.f32.mrb[26].mxu1 }
 0x138   :  { %1017 = vmax.xlane.f32.xlu0 %v1016_v25  ;;  %v5153_v54 = vmul.f32 0.17677669, %v813_v55  ;;  %v4184_v23 = vpop.f32.mrb[27].mxu1  ;;  %v1022_v31 = vsel %vm943_vm2, %v5147_v4, -inf }
 0x139   :  { %v1019_v39 = vsel %vm943_vm2, %v5149_v5, -inf }
 0x13a   :  { %1020 = vmax.xlane.f32.xlu1 %v1019_v39  ;;  %v1025_v52 = vsel %vm943_vm2, %v5153_v54, -inf }
 0x13c   :  { %1023 = vmax.xlane.f32.xlu0 %v1022_v31  ;;  %v857_v3 = vpop.f32.mrb[28].mxu0 }
 0x13d   :  { %v5161_v1 = vmul.f32 0.17677669, %v857_v3  ;;  %v4189_v9 = vpop.f32.mrb[29].mxu0  ;;  %v904_v21 = vpop.f32.mrb[28].mxu1 }
 0x13e   :  { %1026 = vmax.xlane.f32.xlu1 %v1025_v52  ;;  %v860_v55 = vpop.f32.mrb[30].mxu0  ;;  %v5163_v25 = vmul.f32 0.17677669, %v904_v21  ;;  %v4195_v23 = vpop.f32.mrb[29].mxu1 }
 0x13f   :  { %v5165_v36 = vmul.f32 0.17677669, %v860_v55  ;;  %v4190_v35 = vpop.f32.mrb[31].mxu0  ;;  %v1028_v39 = vsel %vm943_vm2, %v5161_v1, -inf  ;;  %v907_v15 = vpop.f32.mrb[30].mxu1 }
 0x140   :  { %1029 = vmax.xlane.f32.xlu0 %v1028_v39  ;;  %v5169_v14 = vmul.f32 0.17677669, %v907_v15  ;;  %v4196_v31 = vpop.f32.mrb[31].mxu1  ;;  %v1034_v52 = vsel %vm943_vm2, %v5163_v25, -inf }
 0x141   :  { %v1031_v3 = vsel %vm943_vm2, %v5165_v36, -inf }
 0x142   :  { %1032 = vmax.xlane.f32.xlu1 %v1031_v3  ;;  %v1037_v9 = vsel %vm943_vm2, %v5169_v14, -inf }
 0x144   :  { %1035 = vmax.xlane.f32.xlu0 %v1034_v52 }
 0x146   :  { %1038 = vmax.xlane.f32.xlu1 %v1037_v9 }
 0x195   :  { %v946_v35 = vpop.xlane.xlu0 %945 }
 0x196   :  { %v952_v21 = vpop.xlane.xlu1 %951  ;;  %v1040_v55 = vsub.f32 %v5049_v8, %v946_v35 }
 0x197   :  { %v1042_v15 = vsub.f32 %v5051_v12, %v952_v21 }
 0x198   :  { %v1072_v23 = vmul.f32 1.442695, %v1040_v55 }
 0x199   :  { %v1076_v39 = vmul.f32 1.442695, %v1042_v15  ;;  %v949_v31 = vpop.xlane.xlu0 %948 }
 0x19a   :  { %4444 = vpow2.f32 %v1072_v23  ;;  %v955_v62 = vpop.xlane.xlu1 %954  ;;  %v1041_v61 = vsub.f32 %v5053_v16, %v949_v31 }
 0x19b   :  { %v1043_v3 = vsub.f32 %v5057_v24, %v955_v62  ;;  %4446 = vpow2.f32 %v1076_v39 }
 0x19c   :  { %v1074_v50 = vmul.f32 1.442695, %v1041_v61 }
 0x19d   :  { %v1078_v49 = vmul.f32 1.442695, %v1043_v3  ;;  %v958_v52 = vpop.xlane.xlu0 %957 }
 0x19e   :  { %4448 = vpow2.f32 %v1074_v50  ;;  %v1044_v9 = vsub.f32 %v5065_v37, %v958_v52 }
 0x19f   :  { %v961_v38 = vpop.xlane.xlu1 %960  ;;  %4450 = vpow2.f32 %v1078_v49 }
 0x1a0   :  { %v1080_v8 = vmul.f32 1.442695, %v1044_v9  ;;  %v1045_v12 = vsub.f32 %v5069_v46, %v961_v38 }
 0x1a1   :  { %v964_v35 = vpop.xlane.xlu0 %963 }
 0x1a2   :  { %4452 = vpow2.f32 %v1080_v8  ;;  %v1082_v21 = vmul.f32 1.442695, %v1045_v12  ;;  %v1046_v55 = vsub.f32 %v5067_v44, %v964_v35 }
 0x1a3   :  { %v967_v16 = vpop.xlane.xlu1 %966 }
 0x1a4   :  { %v5184_v15 = vpop.eup %4444  ;;  %4454 = vpow2.f32 %v1082_v21  ;;  %v1084_v61 = vmul.f32 1.442695, %v1046_v55  ;;  %v1047_v62 = vsub.f32 %v5073_v56, %v967_v16 }
 0x1a5   :  { %v970_v50 = vpop.xlane.xlu0 %969  ;;  %v1136_v24 = vsel %vm943_vm2, %v5184_v15, 0.0  ;;  %v5189_v49 = vpop.eup %4446 }
 0x1a6   :  { %4456 = vpow2.f32 %v1084_v61  ;;  %v1086_v38 = vmul.f32 1.442695, %v1047_v62  ;;  %v1048_v37 = vsub.f32 %v5081_v7, %v970_v50  ;;  %1137 = vadd.xlane.f32.xlu0 %v1136_v24  ;;  %v1142_v56 = vsel %vm943_vm2, %v5189_v49, 0.0 }
 0x1a7   :  { %v973_v46 = vpop.xlane.xlu1 %972 }
 0x1a8   :  { %v5192_v44 = vpop.eup %4448  ;;  %4458 = vpow2.f32 %v1086_v38  ;;  %v1088_v23 = vmul.f32 1.442695, %v1048_v37  ;;  %v1049_v39 = vsub.f32 %v5085_v22, %v973_v46 }
 0x1a9   :  { %v976_v31 = vpop.xlane.xlu0 %975  ;;  %v1139_v3 = vsel %vm943_vm2, %v5192_v44, 0.0  ;;  %v5199_v52 = vpop.eup %4450 }
 0x1aa   :  { %4460 = vpow2.f32 %v1088_v23  ;;  %v1090_v9 = vmul.f32 1.442695, %v1049_v39  ;;  %v1050_v7 = vsub.f32 %v5083_v6, %v976_v31  ;;  %1143 = vadd.xlane.f32.xlu0 %v1142_v56  ;;  %1140 = vadd.xlane.f32.xlu1 %v1139_v3  ;;  %v1145_v16 = vsel %vm943_vm2, %v5199_v52, 0.0 }
 0x1ab   :  { %v979_v8 = vpop.xlane.xlu1 %978 }
 0x1ac   :  { %v5202_v12 = vpop.eup %4452  ;;  %4462 = vpow2.f32 %v1090_v9  ;;  %v1092_v22 = vmul.f32 1.442695, %v1050_v7  ;;  %v1051_v35 = vsub.f32 %v5089_v27, %v979_v8 }
 0x1ad   :  { %v982_v21 = vpop.xlane.xlu0 %981  ;;  %v1148_v55 = vsel %vm943_vm2, %v5202_v12, 0.0 }
 0x1ae   :  { %v5209_v61 = vpop.eup %4454  ;;  %4464 = vpow2.f32 %v1092_v22  ;;  %v1094_v6 = vmul.f32 1.442695, %v1051_v35  ;;  %v1052_v62 = vsub.f32 %v5097_v45, %v982_v21  ;;  %1149 = vadd.xlane.f32.xlu0 %v1148_v55  ;;  %1146 = vadd.xlane.f32.xlu1 %v1145_v16 }
 0x1af   :  { %v985_v50 = vpop.xlane.xlu1 %984  ;;  %v1151_v23 = vsel %vm943_vm2, %v5209_v61, 0.0 }
 0x1b0   :  { %v5212_v24 = vpop.eup %4456  ;;  %4466 = vpow2.f32 %v1094_v6  ;;  %v1096_v27 = vmul.f32 1.442695, %v1052_v62  ;;  %v1053_v38 = vsub.f32 %v5101_v63, %v985_v50 }
 0x1b1   :  { %v988_v37 = vpop.xlane.xlu0 %987  ;;  %v1154_v46 = vsel %vm943_vm2, %v5212_v24, 0.0 }
 0x1b2   :  { %v5219_v39 = vpop.eup %4458  ;;  %4468 = vpow2.f32 %v1096_v27  ;;  %v1098_v45 = vmul.f32 1.442695, %v1053_v38  ;;  %v1054_v31 = vsub.f32 %v5099_v58, %v988_v37  ;;  %1155 = vadd.xlane.f32.xlu0 %v1154_v46  ;;  %1152 = vadd.xlane.f32.xlu1 %v1151_v23 }
 0x1b3   :  { %v991_v56 = vpop.xlane.xlu1 %990  ;;  %v1157_v22 = vsel %vm943_vm2, %v5219_v39, 0.0 }
 0x1b4   :  { %v5222_v3 = vpop.eup %4460  ;;  %4470 = vpow2.f32 %v1098_v45  ;;  %v1100_v63 = vmul.f32 1.442695, %v1054_v31  ;;  %v1055_v9 = vsub.f32 %v5105_v11, %v991_v56 }
 0x1b5   :  { %v994_v7 = vpop.xlane.xlu0 %993  ;;  %v1160_v8 = vsel %vm943_vm2, %v5222_v3, 0.0 }
 0x1b6   :  { %v5229_v35 = vpop.eup %4462  ;;  %4472 = vpow2.f32 %v1100_v63  ;;  %v1102_v58 = vmul.f32 1.442695, %v1055_v9  ;;  %v1056_v21 = vsub.f32 %v5113_v30, %v994_v7  ;;  %1161 = vadd.xlane.f32.xlu0 %v1160_v8  ;;  %1158 = vadd.xlane.f32.xlu1 %v1157_v22 }
 0x1b7   :  { %v997_v55 = vpop.xlane.xlu1 %996  ;;  %v1163_v27 = vsel %vm943_vm2, %v5229_v35, 0.0 }
 0x1b8   :  { %v5232_v16 = vpop.eup %4464  ;;  %4474 = vpow2.f32 %v1102_v58  ;;  %v1104_v11 = vmul.f32 1.442695, %v1056_v21  ;;  %v1057_v6 = vsub.f32 %v5117_v51, %v997_v55 }
 0x1b9   :  { %v1000_v62 = vpop.xlane.xlu0 %999  ;;  %v1166_v50 = vsel %vm943_vm2, %v5232_v16, 0.0 }
 0x1ba   :  { %v5239_v38 = vpop.eup %4466  ;;  %4476 = vpow2.f32 %v1104_v11  ;;  %v1106_v30 = vmul.f32 1.442695, %v1057_v6  ;;  %v1058_v37 = vsub.f32 %v5115_v43, %v1000_v62  ;;  %1167 = vadd.xlane.f32.xlu0 %v1166_v50  ;;  %1164 = vadd.xlane.f32.xlu1 %v1163_v27 }
 0x1bb   :  { %v1003_v46 = vpop.xlane.xlu1 %1002  ;;  %v1169_v63 = vsel %vm943_vm2, %v5239_v38, 0.0 }
 0x1bc   :  { %v5242_v23 = vpop.eup %4468  ;;  %4478 = vpow2.f32 %v1106_v30  ;;  %v1108_v51 = vmul.f32 1.442695, %v1058_v37  ;;  %v1059_v45 = vsub.f32 %v5121_v2, %v1003_v46 }
 0x1bd   :  { %v1006_v31 = vpop.xlane.xlu0 %1005  ;;  %v1172_v56 = vsel %vm943_vm2, %v5242_v23, 0.0 }
 0x1be   :  { %v5249_v9 = vpop.eup %4470  ;;  %4480 = vpow2.f32 %v1108_v51  ;;  %v1110_v43 = vmul.f32 1.442695, %v1059_v45  ;;  %v1060_v7 = vsub.f32 %v5129_v26, %v1006_v31  ;;  %1173 = vadd.xlane.f32.xlu0 %v1172_v56  ;;  %1170 = vadd.xlane.f32.xlu1 %v1169_v63 }
 0x1bf   :  { %v1009_v8 = vpop.xlane.xlu1 %1008  ;;  %v1175_v11 = vsel %vm943_vm2, %v5249_v9, 0.0 }
 0x1c0   :  { %v5252_v22 = vpop.eup %4472  ;;  %4482 = vpow2.f32 %v1110_v43  ;;  %v1112_v2 = vmul.f32 1.442695, %v1060_v7  ;;  %v1061_v58 = vsub.f32 %v5133_v59, %v1009_v8 }
 0x1c1   :  { %v1012_v21 = vpop.xlane.xlu0 %1011  ;;  %v1178_v55 = vsel %vm943_vm2, %v5252_v22, 0.0 }
 0x1c2   :  { %v5259_v6 = vpop.eup %4474  ;;  %4484 = vpow2.f32 %v1112_v2  ;;  %v1114_v26 = vmul.f32 1.442695, %v1061_v58  ;;  %v1062_v62 = vsub.f32 %v5131_v47, %v1012_v21  ;;  %1179 = vadd.xlane.f32.xlu0 %v1178_v55  ;;  %1176 = vadd.xlane.f32.xlu1 %v1175_v11 }
 0x1c3   :  { %v1015_v50 = vpop.xlane.xlu1 %1014  ;;  %v1181_v51 = vsel %vm943_vm2, %v5259_v6, 0.0 }
 0x1c4   :  { %v5262_v27 = vpop.eup %4476  ;;  %4486 = vpow2.f32 %v1114_v26  ;;  %v1116_v59 = vmul.f32 1.442695, %v1062_v62  ;;  %v1063_v30 = vsub.f32 %v5137_v0, %v1015_v50 }
 0x1c5   :  { %v1018_v37 = vpop.xlane.xlu0 %1017  ;;  %v1184_v46 = vsel %vm943_vm2, %v5262_v27, 0.0 }
 0x1c6   :  { %v5269_v45 = vpop.eup %4478  ;;  %4488 = vpow2.f32 %v1116_v59  ;;  %v1118_v47 = vmul.f32 1.442695, %v1063_v30  ;;  %v1064_v31 = vsub.f32 %v5145_v40, %v1018_v37  ;;  %1185 = vadd.xlane.f32.xlu0 %v1184_v46  ;;  %1182 = vadd.xlane.f32.xlu1 %v1181_v51 }
 0x1c7   :  { %v1021_v56 = vpop.xlane.xlu1 %1020  ;;  %v1187_v2 = vsel %vm943_vm2, %v5269_v45, 0.0 }
 0x1c8   :  { %v5272_v63 = vpop.eup %4480  ;;  %4490 = vpow2.f32 %v1118_v47  ;;  %v1120_v0 = vmul.f32 1.442695, %v1064_v31  ;;  %v1065_v43 = vsub.f32 %v5149_v5, %v1021_v56 }
 0x1c9   :  { %v1024_v7 = vpop.xlane.xlu0 %1023  ;;  %v1190_v8 = vsel %vm943_vm2, %v5272_v63, 0.0 }
 0x1ca   :  { %v5279_v58 = vpop.eup %4482  ;;  %4492 = vpow2.f32 %v1120_v0  ;;  %v1122_v40 = vmul.f32 1.442695, %v1065_v43  ;;  %v1066_v21 = vsub.f32 %v5147_v4, %v1024_v7  ;;  %1191 = vadd.xlane.f32.xlu0 %v1190_v8  ;;  %1188 = vadd.xlane.f32.xlu1 %v1187_v2 }
 0x1cb   :  { %v1027_v55 = vpop.xlane.xlu1 %1026  ;;  %v1193_v59 = vsel %vm943_vm2, %v5279_v58, 0.0 }
 0x1cc   :  { %v5282_v11 = vpop.eup %4484  ;;  %4494 = vpow2.f32 %v1122_v40  ;;  %v1124_v5 = vmul.f32 1.442695, %v1066_v21  ;;  %v1067_v26 = vsub.f32 %v5153_v54, %v1027_v55 }
 0x1cd   :  { %v1030_v62 = vpop.xlane.xlu0 %1029  ;;  %v1196_v50 = vsel %vm943_vm2, %v5282_v11, 0.0 }
 0x1ce   :  { %v5289_v30 = vpop.eup %4486  ;;  %4496 = vpow2.f32 %v1124_v5  ;;  %v1126_v4 = vmul.f32 1.442695, %v1067_v26  ;;  %v1068_v37 = vsub.f32 %v5161_v1, %v1030_v62  ;;  %1197 = vadd.xlane.f32.xlu0 %v1196_v50  ;;  %1194 = vadd.xlane.f32.xlu1 %v1193_v59 }
 0x1cf   :  { %v1033_v46 = vpop.xlane.xlu1 %1032  ;;  %v1199_v0 = vsel %vm943_vm2, %v5289_v30, 0.0 }
 0x1d0   :  { %v5292_v51 = vpop.eup %4488  ;;  %4498 = vpow2.f32 %v1126_v4  ;;  %v1128_v54 = vmul.f32 1.442695, %v1068_v37  ;;  %v1069_v47 = vsub.f32 %v5165_v36, %v1033_v46 }
 0x1d1   :  { %v1036_v31 = vpop.xlane.xlu0 %1035  ;;  %v1202_v56 = vsel %vm943_vm2, %v5292_v51, 0.0 }
 0x1d2   :  { %v5299_v43 = vpop.eup %4490  ;;  %4500 = vpow2.f32 %v1128_v54  ;;  %v1130_v1 = vmul.f32 1.442695, %v1069_v47  ;;  %v1070_v7 = vsub.f32 %v5163_v25, %v1036_v31  ;;  %1203 = vadd.xlane.f32.xlu0 %v1202_v56  ;;  %1200 = vadd.xlane.f32.xlu1 %v1199_v0 }
 0x1d3   :  { %v1039_v8 = vpop.xlane.xlu1 %1038  ;;  %v1205_v55 = vsel %vm943_vm2, %v5299_v43, 0.0 }
 0x1d4   :  { %v5302_v2 = vpop.eup %4492  ;;  %4502 = vpow2.f32 %v1130_v1  ;;  %v1132_v36 = vmul.f32 1.442695, %v1070_v7  ;;  %v1071_v40 = vsub.f32 %v5169_v14, %v1039_v8 }
 0x1d5   :  { %v1208_v21 = vsel %vm943_vm2, %v5302_v2, 0.0 }
 0x1d6   :  { %v5309_v5 = vpop.eup %4494  ;;  %4504 = vpow2.f32 %v1132_v36  ;;  %v1134_v26 = vmul.f32 1.442695, %v1071_v40  ;;  %1209 = vadd.xlane.f32.xlu0 %v1208_v21  ;;  %1206 = vadd.xlane.f32.xlu1 %v1205_v55 }
 0x1d7   :  { %v1211_v14 = vsel %vm943_vm2, %v5309_v5, 0.0 }
 0x1d8   :  { %v5311_v25 = vpop.eup %4496  ;;  %4506 = vpow2.f32 %v1134_v26 }
 0x1d9   :  { %v1214_v62 = vsel %vm943_vm2, %v5311_v25, 0.0 }
 0x1da   :  { %v5317_v50 = vpop.eup %4498  ;;  %1215 = vadd.xlane.f32.xlu0 %v1214_v62  ;;  %1212 = vadd.xlane.f32.xlu1 %v1211_v14 }
 0x1db   :  { %v1217_v37 = vsel %vm943_vm2, %v5317_v50, 0.0 }
 0x1dc   :  { %v5319_v59 = vpop.eup %4500 }
 0x1dd   :  { %v1220_v4 = vsel %vm943_vm2, %v5319_v59, 0.0 }
 0x1de   :  { %v5325_v46 = vpop.eup %4502  ;;  %1221 = vadd.xlane.f32.xlu0 %v1220_v4  ;;  %1218 = vadd.xlane.f32.xlu1 %v1217_v37  ;;  %v4778_v37 = vmov 1983009808  }
 0x1df   :  { %v1223_v31 = vsel %vm943_vm2, %v5325_v46, 0.0 }
 0x1e0   :  { %v5327_v54 = vpop.eup %4504 }
 0x1e1   :  { %v1226_v47 = vsel %vm943_vm2, %v5327_v54, 0.0 }
 0x1e2   :  { %v5333_v56 = vpop.eup %4506  ;;  %1227 = vadd.xlane.f32.xlu0 %v1226_v47  ;;  %1224 = vadd.xlane.f32.xlu1 %v1223_v31  ;;  %v1299_v47 = vunpack.c.l.s4 %v4778_v37  ;;  %v1301_v31 = vlaneseq }
 0x1e3   :  { %v1229_v0 = vsel %vm943_vm2, %v5333_v56, 0.0 }
 0x1e4   :  { %v1300_v20 = vunpack.c.0.s8 %v1299_v47  ;;  %v5343_v19 = vshrl.u32 %v1301_v31, 7 }
 0x1e6   :  { %1230 = vadd.xlane.f32.xlu1 %v1229_v0  ;;  %v5357_v31 = vsub.s32 %v1300_v20, %v5343_v19 }
 0x233   :  { %v1138_v1 = vpop.xlane.xlu0 %1137 }
 0x234   :  { %4508 = vrcp.f32 %v1138_v1 }
 0x237   :  { %v1144_v7 = vpop.xlane.xlu0 %1143  ;;  %v1141_v8 = vpop.xlane.xlu1 %1140 }
 0x238   :  { %4510 = vrcp.f32 %v1141_v8 }
 0x239   :  { %4512 = vrcp.f32 %v1144_v7 }
 0x23b   :  { %v1150_v36 = vpop.xlane.xlu0 %1149  ;;  %v1147_v40 = vpop.xlane.xlu1 %1146 }
 0x23c   :  { %4514 = vrcp.f32 %v1150_v36 }
 0x23d   :  { %4516 = vrcp.f32 %v1147_v40 }
 0x23e   :  { %v4509_v26 = vpop.eup %4508 }
 0x23f   :  { %v1156_v21 = vpop.xlane.xlu0 %1155  ;;  %v1153_v55 = vpop.xlane.xlu1 %1152  ;;  %v1264_v0 = vmul.f32 %v4509_v26, %v5184_v15 }
 0x240   :  { %4518 = vrcp.f32 %v1156_v21 }
 0x241   :  { %4520 = vrcp.f32 %v1153_v55 }
 0x242   :  { %v4511_v62 = vpop.eup %4510 }
 0x243   :  { %v1162_v14 = vpop.xlane.xlu0 %1161  ;;  %v1159_v4 = vpop.xlane.xlu1 %1158  ;;  %v5339_v1 = vmul.f32 %v4511_v62, %v5192_v44  ;;  %v6300_v44 = vmov 0.0  }
 0x244   :  { %v4513_v7 = vpop.eup %4512  ;;  %4522 = vrcp.f32 %v1159_v4 }
 0x245   :  { %4524 = vrcp.f32 %v1162_v14  ;;  %v1989_v36 = vpack.c.bf16 %v5339_v1, %v1264_v0  ;;  %v1266_v37 = vmul.f32 %v4513_v7, %v5189_v49  ;;  %v4779_v7 = vmov 1934713408  }
 0x246   :  { %v4515_v8 = vpop.eup %4514 }
 0x247   :  { %v4517_v40 = vpop.eup %4516  ;;  %v1268_v21 = vmul.f32 %v4515_v8, %v5202_v12  ;;  %v1168_v55 = vpop.xlane.xlu0 %1167  ;;  %4200 = vmatmul.mubr.msk.bf16.vlgmr.msra.gmra.mrb[32].mxu0 %vm943_vm2, %v1989_v36  ;;  %v1363_v8 = vunpack.c.l.s4 %v4779_v7 }
 0x248   :  { %v1165_v34 = vpop.xlane.xlu1 %1164  ;;  %v5347_v15 = vmul.f32 %v4517_v40, %v5199_v52  ;;  %4210 = vmatpush3.bf16.msra.mxu0 %v4878_v17  ;;  %4211 = vmatprep.mubr.msk.bf16.mxu0 %vm4777_vm0, %v6300_v44 }
 0x249   :  { %4526 = vrcp.f32 %v1165_v34  ;;  %v1296_v26 = vcombine.low %v1264_v0, %v1268_v21  ;;  %v1297_v12 = vcombine.high %v1264_v0, %v1268_v21  ;;  %4221 = vmatprep.subr.bf16.mxu0 %v6300_v44  ;;  %v1364_v7 = vunpack.c.0.s8 %v1363_v8 }
 0x24a   :  { %v4519_v62 = vpop.eup %4518  ;;  %v1990_v14 = vpack.c.bf16 %v5347_v15, %v1266_v37  ;;  %4528 = vrcp.f32 %v1168_v55 }
 0x24b   :  { %v4521_v4 = vpop.eup %4520  ;;  %v1270_v49 = vmul.f32 %v4519_v62, %v5212_v24  ;;  %v1174_v52 = vpop.xlane.xlu0 %1173 }
 0x24c   :  { %v1171_v47 = vpop.xlane.xlu1 %1170  ;;  %v1269_v17 = vmul.f32 %v4521_v4, %v5209_v61  ;;  %4530 = vrcp.f32 %v1174_v52  ;;  %4206 = vmatmul.mubr.msk.bf16.vlgmr.msra.gmra.mrb[32].mxu1 %vm943_vm2, %v1990_v14 }
 0x24d   :  { %4216 = vmatpush3.bf16.msra.mxu1 %v4881_v18  ;;  %4532 = vrcp.f32 %v1171_v47  ;;  %4217 = vmatprep.mubr.msk.bf16.mxu1 %vm4777_vm0, %v6300_v44  ;;  %v1312_v34 = vcombine.low %v1266_v37, %v1270_v49  ;;  %v1313_v0 = vcombine.high %v1266_v37, %v1270_v49  ;;  %v5368_v18 = vrot.slane %v1296_v26, %v5357_v31 }
 0x24e   :  { %v1991_v24 = vpack.c.bf16 %v1269_v17, %v1268_v21  ;;  %4227 = vmatprep.subr.bf16.mxu1 %v6300_v44  ;;  %v1568_v20 = vcombine.low %v5339_v1, %v1269_v17  ;;  %v1569_v61 = vcombine.high %v5339_v1, %v1269_v17  ;;  %v4523_v36 = vpop.eup %4522  ;;  %v5374_v37 = vrot.slane %v1297_v12, %v5357_v31 }
 0x24f   :  { %v1180_v40 = vpop.xlane.xlu0 %1179  ;;  %v5371_v62 = vrot.slane %v1312_v34, %v5357_v31  ;;  %v5377_v21 = vrot.slane %v1313_v0, %v5357_v31  ;;  %v4525_v14 = vpop.eup %4524  ;;  %v1271_v4 = vmul.f32 %v4523_v36, %v5219_v39 }
 0x250   :  { %v1177_v55 = vpop.xlane.xlu1 %1176  ;;  %4534 = vrcp.f32 %v1180_v40  ;;  %4212 = vmatmul.mubr.msk.bf16.vlgmr.msra.gmra.mrb[36].mxu0 %vm943_vm2, %v1991_v24  ;;  %v5396_v34 = vmul.f32 %v4525_v14, %v5222_v3  ;;  %v1576_v36 = vrot.slane %v1568_v20, %v5357_v31  ;;  %v5420_v14 = vsub.s32 %v1364_v7, %v5343_v19 }
 0x251   :  { %4536 = vrcp.f32 %v1177_v55  ;;  %4222 = vmatpush3.bf16.msra.mxu0 %v4897_v29  ;;  %4223 = vmatprep.mubr.msk.bf16.mxu0 %vm4777_vm0, %v6300_v44  ;;  %v1360_v1 = vcombine.low %v5368_v18, %v5371_v62  ;;  %v1361_v26 = vcombine.high %v5368_v18, %v5371_v62  ;;  %v1376_v12 = vcombine.low %v5374_v37, %v5377_v21 }
 0x252   :  { %v1992_v52 = vpack.c.bf16 %v1271_v4, %v1270_v49  ;;  %4233 = vmatprep.subr.bf16.mxu0 %v6300_v44  ;;  %v1584_v39 = vcombine.low %v5347_v15, %v1271_v4  ;;  %v1585_v47 = vcombine.high %v5347_v15, %v1271_v4  ;;  %v1377_v29 = vcombine.high %v5374_v37, %v5377_v21 }
 0x253   :  { %v4527_v17 = vpop.eup %4526  ;;  %v1186_v0 = vpop.xlane.xlu0 %1185  ;;  %v5400_v49 = vrot.slane %v1569_v61, %v5357_v31  ;;  %v5441_v7 = vrot.slane %v1361_v26, %v5420_v14 }
 0x254   :  { %v1183_v24 = vpop.xlane.xlu1 %1182  ;;  %v5403_v40 = vmul.f32 %v4527_v17, %v5229_v35  ;;  %4538 = vrcp.f32 %v1186_v0  ;;  %4218 = vmatmul.mubr.msk.bf16.vlgmr.msra.gmra.mrb[36].mxu1 %vm943_vm2, %v1992_v52  ;;  %v1592_v15 = vrot.slane %v1584_v39, %v5357_v31  ;;  %v5408_v55 = vrot.slane %v1585_v47, %v5357_v31  ;;  %v4529_v3 = vpop.eup %4528 }
 0x255   :  { %4228 = vmatpush3.bf16.msra.mxu1 %v4902_v32  ;;  %4540 = vrcp.f32 %v1183_v24  ;;  %4229 = vmatprep.mubr.msk.bf16.mxu1 %vm4777_vm0, %v6300_v44  ;;  %v1274_v52 = vmul.f32 %v4529_v3, %v5232_v16 }
 0x256   :  { %v4531_v8 = vpop.eup %4530  ;;  %v1993_v35 = vpack.c.bf16 %v5403_v40, %v5396_v34  ;;  %4239 = vmatprep.subr.bf16.mxu1 %v6300_v44  ;;  %v1632_v20 = vcombine.low %v1576_v36, %v1592_v15  ;;  %v1633_v61 = vcombine.high %v1576_v36, %v1592_v15  ;;  %v1648_v18 = vcombine.low %v5400_v49, %v5408_v55 }
 0x257   :  { %v4533_v62 = vpop.eup %4532  ;;  %v1276_v37 = vmul.f32 %v4531_v8, %v5242_v23  ;;  %v1192_v21 = vpop.xlane.xlu0 %1191  ;;  %v1649_v4 = vcombine.high %v5400_v49, %v5408_v55  ;;  %v5444_v36 = vrot.slane %v1376_v12, %v5420_v14 }
 0x258   :  { %v1189_v32 = vpop.xlane.xlu1 %1188  ;;  %v5426_v39 = vmul.f32 %v4533_v62, %v5239_v38  ;;  %4224 = vmatmul.mubr.msk.bf16.vlgmr.msra.gmra.mrb[40].mxu0 %vm943_vm2, %v1993_v35  ;;  %v5449_v15 = vrot.slane %v1632_v20, %v5420_v14  ;;  %v5458_v26 = vrot.slane %v1633_v61, %v5420_v14  ;;  %v5464_v35 = vrot.slane %v1648_v18, %v5420_v14 }
 0x259   :  { %4542 = vrcp.f32 %v1189_v32  ;;  %4234 = vmatpush3.bf16.msra.mxu0 %v4913_v41  ;;  %4235 = vmatprep.mubr.msk.bf16.mxu0 %vm4777_vm0, %v6300_v44  ;;  %v1328_v23 = vcombine.low %v5396_v34, %v1276_v37  ;;  %v1329_v19 = vcombine.high %v5396_v34, %v1276_v37  ;;  %v5438_v41 = vrot.slane %v1360_v1, %v5420_v14 }
 0x25a   :  { %v4535_v47 = vpop.eup %4534  ;;  %4544 = vrcp.f32 %v1192_v21  ;;  %v1994_v17 = vpack.c.bf16 %v5426_v39, %v1274_v52  ;;  %4245 = vmatprep.subr.bf16.mxu0 %v6300_v44 }
 0x25b   :  { %v4537_v16 = vpop.eup %4536  ;;  %v1278_v38 = vmul.f32 %v4535_v47, %v5252_v22  ;;  %v1198_v0 = vpop.xlane.xlu0 %1197  ;;  %v5452_v22 = vrot.slane %v1377_v29, %v5420_v14  ;;  %v1336_v21 = vrot.slane %v1328_v23, %v5357_v31  ;;  %v1343_v32 = vrot.slane %v1329_v19, %v5357_v31 }
 0x25c   :  { %v1195_v24 = vpop.xlane.xlu1 %1194  ;;  %v1277_v34 = vmul.f32 %v4537_v16, %v5249_v9  ;;  %4546 = vrcp.f32 %v1198_v0  ;;  %4230 = vmatmul.mubr.msk.bf16.vlgmr.msra.gmra.mrb[40].mxu1 %vm943_vm2, %v1994_v17 }
 0x25d   :  { %4240 = vmatpush3.bf16.msra.mxu1 %v4915_v42  ;;  %4548 = vrcp.f32 %v1195_v24  ;;  %4241 = vmatprep.mubr.msk.bf16.mxu1 %vm4777_vm0, %v6300_v44  ;;  %v1344_v1 = vcombine.low %v1274_v52, %v1278_v38  ;;  %v1345_v9 = vcombine.high %v1274_v52, %v1278_v38 }
 0x25e   :  { %v4539_v12 = vpop.eup %4538  ;;  %v1995_v3 = vpack.c.bf16 %v1277_v34, %v1276_v37  ;;  %4251 = vmatprep.subr.bf16.mxu1 %v6300_v44  ;;  %v1600_v8 = vcombine.low %v5403_v40, %v1277_v34  ;;  %v1601_v29 = vcombine.high %v5403_v40, %v1277_v34 }
 0x25f   :  { %v4541_v42 = vpop.eup %4540  ;;  %v1204_v20 = vpop.xlane.xlu0 %1203  ;;  %v1352_v61 = vrot.slane %v1344_v1, %v5357_v31  ;;  %v1359_v37 = vrot.slane %v1345_v9, %v5357_v31  ;;  %v5471_v52 = vmul.f32 %v4539_v12, %v5262_v27 }
 0x260   :  { %v1201_v62 = vpop.xlane.xlu1 %1200  ;;  %v1279_v47 = vmul.f32 %v4541_v42, %v5259_v6  ;;  %4550 = vrcp.f32 %v1204_v20  ;;  %4236 = vmatmul.mubr.msk.bf16.vlgmr.msra.gmra.mrb[44].mxu0 %vm943_vm2, %v1995_v3  ;;  %v1608_v40 = vrot.slane %v1600_v8, %v5357_v31 }
 0x261   :  { %4552 = vrcp.f32 %v1201_v62  ;;  %4246 = vmatpush3.bf16.msra.mxu0 %v4941_v57  ;;  %4247 = vmatprep.mubr.msk.bf16.mxu0 %vm4777_vm0, %v6300_v44  ;;  %v1392_v18 = vcombine.low %v1336_v21, %v1352_v61  ;;  %v1393_v23 = vcombine.high %v1336_v21, %v1352_v61  ;;  %v1408_v19 = vcombine.low %v1343_v32, %v1359_v37 }
 0x262   :  { %v1996_v17 = vpack.c.bf16 %v1279_v47, %v1278_v38  ;;  %4257 = vmatprep.subr.bf16.mxu0 %v6300_v44  ;;  %v1616_v27 = vcombine.low %v5426_v39, %v1279_v47  ;;  %v1617_v6 = vcombine.high %v5426_v39, %v1279_v47  ;;  %v1409_v16 = vcombine.high %v1343_v32, %v1359_v37 }
 0x263   :  { %v4543_v0 = vpop.eup %4542  ;;  %v1210_v24 = vpop.xlane.xlu0 %1209  ;;  %v5483_v1 = vrot.slane %v1392_v18, %v5420_v14  ;;  %v5486_v57 = vrot.slane %v1393_v23, %v5420_v14  ;;  %v5489_v9 = vrot.slane %v1408_v19, %v5420_v14  ;;  %v5492_v38 = vrot.slane %v1601_v29, %v5357_v31 }
 0x264   :  { %v1207_v34 = vpop.xlane.xlu1 %1206  ;;  %v4545_v12 = vpop.eup %4544  ;;  %v5495_v3 = vmul.f32 %v4543_v0, %v5269_v45  ;;  %4554 = vrcp.f32 %v1210_v24  ;;  %4242 = vmatmul.mubr.msk.bf16.vlgmr.msra.gmra.mrb[44].mxu1 %vm943_vm2, %v1996_v17  ;;  %v1624_v39 = vrot.slane %v1616_v27, %v5357_v31  ;;  %v5500_v8 = vrot.slane %v1617_v6, %v5357_v31 }
 0x265   :  { %4252 = vmatpush3.bf16.msra.mxu1 %v4946_v60  ;;  %4556 = vrcp.f32 %v1207_v34  ;;  %4253 = vmatprep.mubr.msk.bf16.mxu1 %vm4777_vm0, %v6300_v44  ;;  %v1425_v29 = vcombine.high %v5438_v41, %v5483_v1  ;;  %v1426_v45 = vcombine.low %v5441_v7, %v5486_v57  ;;  %v1427_v42 = vcombine.high %v5441_v7, %v5486_v57 }
 0x266   :  { %v4547_v20 = vpop.eup %4546  ;;  %v1997_v62 = vpack.c.bf16 %v5495_v3, %v5471_v52  ;;  %4263 = vmatprep.subr.bf16.mxu1 %v6300_v44  ;;  %v1664_v60 = vcombine.low %v1608_v40, %v1624_v39  ;;  %v1665_v21 = vcombine.high %v1608_v40, %v1624_v39  ;;  %v1428_v61 = vcombine.low %v5444_v36, %v5489_v9 }
 0x267   :  { %v4549_v32 = vpop.eup %4548  ;;  %v1282_v37 = vmul.f32 %v4545_v12, %v5272_v63  ;;  %v1284_v47 = vmul.f32 %v4547_v20, %v5282_v11  ;;  %v1216_v18 = vpop.xlane.xlu0 %1215  ;;  %v1680_v19 = vcombine.low %v5492_v38, %v5500_v8  ;;  %v5533_v11 = vrot.slane %v1409_v16, %v5420_v14 }
 0x268   :  { %v1213_v23 = vpop.xlane.xlu1 %1212  ;;  %v5523_v27 = vmul.f32 %v4549_v32, %v5279_v58  ;;  %4248 = vmatmul.mubr.msk.bf16.vlgmr.msra.gmra.mrb[48].mxu0 %vm943_vm2, %v1997_v62  ;;  %v5527_v40 = vrot.slane %v1664_v60, %v5420_v14  ;;  %v5530_v63 = vrot.slane %v1665_v21, %v5420_v14 }
 0x269   :  { %4558 = vrcp.f32 %v1213_v23  ;;  %4258 = vmatpush3.bf16.msra.mxu0 %v4963_v10  ;;  %4259 = vmatprep.mubr.msk.bf16.mxu0 %vm4777_vm0, %v6300_v44  ;;  %v1432_v58 = vcombine.low %v5471_v52, %v1284_v47  ;;  %v1433_v6 = vcombine.high %v5471_v52, %v1284_v47  ;;  %v5541_v0 = vrot.slane %v1680_v19, %v5420_v14 }
 0x26a   :  { %v4551_v24 = vpop.eup %4550  ;;  %v1998_v34 = vpack.c.bf16 %v5523_v27, %v1282_v37  ;;  %4269 = vmatprep.subr.bf16.mxu0 %v6300_v44  ;;  %v1697_v16 = vcombine.high %v5449_v15, %v5527_v40  ;;  %v1698_v10 = vcombine.low %v5458_v26, %v5530_v63  ;;  %v1699_v12 = vcombine.high %v5458_v26, %v5530_v63 }
 0x26b   :  { %v4553_v39 = vpop.eup %4552  ;;  %v1286_v52 = vmul.f32 %v4551_v24, %v5292_v51  ;;  %4560 = vrcp.f32 %v1216_v18  ;;  %v1222_v20 = vpop.xlane.xlu0 %1221  ;;  %v1700_v60 = vcombine.low %v5464_v35, %v5541_v0  ;;  %v5571_v32 = vrot.slane %v1432_v58, %v5357_v31 }
 0x26c   :  { %v1219_v62 = vpop.xlane.xlu1 %1218  ;;  %v1285_v21 = vmul.f32 %v4553_v39, %v5289_v30  ;;  %4562 = vrcp.f32 %v1222_v20  ;;  %4254 = vmatmul.mubr.msk.bf16.vlgmr.msra.gmra.mrb[48].mxu1 %vm943_vm2, %v1998_v34  ;;  %v1681_v30 = vcombine.high %v5492_v38, %v5500_v8  ;;  %v5577_v38 = vrot.slane %v1433_v6, %v5357_v31 }
 0x26d   :  { %4264 = vmatpush3.bf16.msra.mxu1 %v4968_v13  ;;  %4564 = vrcp.f32 %v1219_v62  ;;  %4265 = vmatprep.mubr.msk.bf16.mxu1 %vm4777_vm0, %v6300_v44  ;;  %v1448_v51 = vcombine.low %v1282_v37, %v1286_v52  ;;  %v1449_v18 = vcombine.high %v1282_v37, %v1286_v52  ;;  %v6302_v26 = vcombine.high %v5444_v36, %v5489_v9 }
 0x26e   :  { %v4555_v19 = vpop.eup %4554  ;;  %v1999_v24 = vpack.c.bf16 %v1285_v21, %v1284_v47  ;;  %4275 = vmatprep.subr.bf16.mxu1 %v6300_v44  ;;  %v1704_v34 = vcombine.low %v5495_v3, %v1285_v21  ;;  %v1705_v39 = vcombine.high %v5495_v3, %v1285_v21  ;;  %v5585_v47 = vrot.slane %v1681_v30, %v5420_v14 }
 0x26f   :  { %v4557_v20 = vpop.eup %4556  ;;  %v1228_v62 = vpop.xlane.xlu0 %1227  ;;  %v5574_v37 = vrot.slane %v1448_v51, %v5357_v31  ;;  %v5580_v8 = vrot.slane %v1449_v18, %v5357_v31  ;;  %v1288_v30 = vmul.f32 %v4555_v19, %v5302_v2  ;;  %v6310_v63 = vcombine.high %v5452_v22, %v5533_v11 }
 0x270   :  { %v1225_v23 = vpop.xlane.xlu1 %1224  ;;  %v1287_v3 = vmul.f32 %v4557_v20, %v5299_v43  ;;  %4566 = vrcp.f32 %v1228_v62  ;;  %4260 = vmatmul.mubr.msk.bf16.vlgmr.msra.gmra.mrb[52].mxu0 %vm943_vm2, %v1999_v24  ;;  %v1712_v20 = vrot.slane %v1704_v34, %v5357_v31 }
 0x271   :  { %4568 = vrcp.f32 %v1225_v23  ;;  %4270 = vmatpush3.bf16.msra.mxu0 %v4985_v28  ;;  %4271 = vmatprep.mubr.msk.bf16.mxu0 %vm4777_vm0, %v6300_v44  ;;  %v1496_v58 = vcombine.low %v5571_v32, %v5574_v37  ;;  %v1497_v6 = vcombine.high %v5571_v32, %v5574_v37  ;;  %v1512_v43 = vcombine.low %v5577_v38, %v5580_v8 }
 0x272   :  { %v2000_v21 = vpack.c.bf16 %v1287_v3, %v1286_v52  ;;  %4281 = vmatprep.subr.bf16.mxu0 %v6300_v44  ;;  %v1720_v51 = vcombine.low %v5523_v27, %v1287_v3  ;;  %v1721_v23 = vcombine.high %v5523_v27, %v1287_v3  ;;  %v1513_v28 = vcombine.high %v5577_v38, %v5580_v8 }
 0x273   :  { %v4559_v18 = vpop.eup %4558  ;;  %v5604_v32 = vrot.slane %v1705_v39, %v5357_v31  ;;  %v5610_v52 = vrot.slane %v1649_v4, %v5420_v14 }
 0x274   :  { %v1231_v24 = vpop.xlane.xlu1 %1230  ;;  %v5613_v27 = vmul.f32 %v4559_v18, %v5309_v5  ;;  %4266 = vmatmul.mubr.msk.bf16.vlgmr.msra.gmra.mrb[52].mxu1 %vm943_vm2, %v2000_v21  ;;  %v1728_v2 = vrot.slane %v1720_v51, %v5357_v31  ;;  %v5618_v19 = vrot.slane %v1721_v23, %v5357_v31 }
 0x275   :  { %4570 = vrcp.f32 %v1231_v24  ;;  %v4561_v34 = vpop.eup %4560  ;;  %4276 = vmatpush3.bf16.msra.mxu1 %v4990_v33  ;;  %4277 = vmatprep.mubr.msk.bf16.mxu1 %vm4777_vm0, %v6300_v44  ;;  %v6308_v9 = vcombine.low %v5610_v52, %v5585_v47 }
 0x276   :  { %v4563_v55 = vpop.eup %4562  ;;  %v2001_v4 = vpack.c.bf16 %v5613_v27, %v1288_v30  ;;  %4287 = vmatprep.subr.bf16.mxu1 %v6300_v44  ;;  %v1768_v39 = vcombine.low %v1712_v20, %v1728_v2  ;;  %v1769_v62 = vcombine.high %v1712_v20, %v1728_v2  ;;  %v1784_v37 = vcombine.low %v5604_v32, %v5618_v19 }
 0x277   :  { %v4565_v33 = vpop.eup %4564  ;;  %v1292_v38 = vmul.f32 %v4563_v55, %v5319_v59  ;;  %v1785_v8 = vcombine.high %v5604_v32, %v5618_v19  ;;  %v1290_v51 = vmul.f32 %v4561_v34, %v5311_v25  ;;  %v5648_v25 = vrot.slane %v1496_v58, %v5420_v14 }
 0x278   :  { %v1291_v23 = vmul.f32 %v4565_v33, %v5317_v50  ;;  %4272 = vmatmul.mubr.msk.bf16.vlgmr.msra.gmra.mrb[56].mxu0 %vm943_vm2, %v2001_v4  ;;  %v5654_v50 = vrot.slane %v1497_v6, %v5420_v14  ;;  %v5667_v6 = vrot.slane %v1768_v39, %v5420_v14 }
 0x279   :  { %4282 = vmatpush3.bf16.msra.mxu0 %v5007_v48  ;;  %4283 = vmatprep.mubr.msk.bf16.mxu0 %vm4777_vm0, %v6300_v44  ;;  %v1464_v59 = vcombine.low %v1288_v30, %v1292_v38  ;;  %v1465_v18 = vcombine.high %v1288_v30, %v1292_v38 }
 0x27a   :  { %v4567_v24 = vpop.eup %4566  ;;  %v2002_v20 = vpack.c.bf16 %v1291_v23, %v1290_v51 }
 0x27b   :  { %v4569_v2 = vpop.eup %4568  ;;  %v1294_v55 = vmul.f32 %v4567_v24, %v5327_v54 }
 0x27c   :  { %v1293_v21 = vmul.f32 %v4569_v2, %v5325_v46  ;;  %4278 = vmatmul.mubr.msk.bf16.vlgmr.msra.gmra.mrb[56].mxu1 %vm943_vm2, %v2002_v20  ;;  %v5658_v46 = vrot.slane %v1512_v43, %v5420_v14  ;;  %v1479_v43 = vrot.slane %v1465_v18, %v5357_v31 }
 0x27d   :  { %4288 = vmatpush3.bf16.msra.mxu1 %v5012_v53  ;;  %4289 = vmatprep.mubr.msk.bf16.mxu1 %vm4777_vm0, %v6300_v44  ;;  %v1480_v48 = vcombine.low %v1290_v51, %v1294_v55  ;;  %v1481_v30 = vcombine.high %v1290_v51, %v1294_v55  ;;  %v1472_v53 = vrot.slane %v1464_v59, %v5357_v31 }
 0x27e   :  { %v2003_v4 = vpack.c.bf16 %v1293_v21, %v1292_v38  ;;  %v1736_v54 = vcombine.low %v5613_v27, %v1293_v21  ;;  %v1737_v58 = vcombine.high %v5613_v27, %v1293_v21  ;;  %v5670_v38 = vrot.slane %v1769_v62, %v5420_v14 }
 0x27f   :  { %v4571_v34 = vpop.eup %4570  ;;  %v1488_v44 = vrot.slane %v1480_v48, %v5357_v31  ;;  %v1495_v24 = vrot.slane %v1481_v30, %v5357_v31  ;;  %v5674_v27 = vrot.slane %v1513_v28, %v5420_v14  ;;  %v5677_v48 = vrot.slane %v1784_v37, %v5420_v14 }
 0x280   :  { %v1295_v33 = vmul.f32 %v4571_v34, %v5333_v56  ;;  %4284 = vmatmul.mubr.msk.bf16.vlgmr.msra.gmra.mrb[60].mxu0 %vm943_vm2, %v2003_v4  ;;  %v1744_v62 = vrot.slane %v1736_v54, %v5357_v31 }
 0x281   :  { %v1528_v21 = vcombine.low %v1472_v53, %v1488_v44  ;;  %v1529_v59 = vcombine.high %v1472_v53, %v1488_v44  ;;  %v1544_v20 = vcombine.low %v1479_v43, %v1495_v24  ;;  %v1545_v30 = vcombine.high %v1479_v43, %v1495_v24 }
 0x282   :  { %v2004_v56 = vpack.c.bf16 %v1295_v33, %v1294_v55  ;;  %v1752_v51 = vcombine.low %v1291_v23, %v1295_v33  ;;  %v1753_v2 = vcombine.high %v1291_v23, %v1295_v33  ;;  %v1751_v23 = vrot.slane %v1737_v58, %v5357_v31 }
 0x283   :  { %v5680_v39 = vrot.slane %v1528_v21, %v5420_v14  ;;  %v5685_v28 = vrot.slane %v1529_v59, %v5420_v14  ;;  %v5689_v55 = vrot.slane %v1544_v20, %v5420_v14  ;;  %v5694_v34 = vrot.slane %v1545_v30, %v5420_v14 }
 0x284   :  { %v1760_v18 = vrot.slane %v1752_v51, %v5357_v31  ;;  %4290 = vmatmul.mubr.msk.bf16.vlgmr.msra.gmra.mrb[60].mxu1 %vm943_vm2, %v2004_v56  ;;  %v1767_v37 = vrot.slane %v1753_v2, %v5357_v31  ;;  %v5721_v20 = vrot.slane %v1785_v8, %v5420_v14 }
 0x285   :  { %v1561_v4 = vcombine.high %v5648_v25, %v5680_v39  ;;  %v1562_v33 = vcombine.low %v5654_v50, %v5685_v28  ;;  %v1563_v44 = vcombine.high %v5654_v50, %v5685_v28  ;;  %v1564_v24 = vcombine.low %v5658_v46, %v5689_v55 }
 0x286   :  { %v1800_v54 = vcombine.low %v1744_v62, %v1760_v18  ;;  %v1801_v53 = vcombine.high %v1744_v62, %v1760_v18  ;;  %v1816_v58 = vcombine.low %v1751_v23, %v1767_v37  ;;  %v1817_v51 = vcombine.high %v1751_v23, %v1767_v37 }
 0x287   :  { %v6303_v57 = vcombine.high %v5658_v46, %v5689_v55  ;;  %v6307_v36 = vcombine.low %v5674_v27, %v5694_v34 }
 0x288   :  { %v5707_v43 = vrot.slane %v1800_v54, %v5420_v14  ;;  %v5710_v56 = vrot.slane %v1801_v53, %v5420_v14  ;;  %v5715_v59 = vrot.slane %v1816_v58, %v5420_v14  ;;  %v5734_v37 = vrot.slane %v1817_v51, %v5420_v14  ;;  %v4434_v14 = vld [vmem:[%s6258_s2] sm:$0xff]   ;;  %v4435_v58 = vld [vmem:[%s6258_s2 + $0x8] sm:$0xff]   ;;  %v4436_v51 = vld [vmem:[%s6258_s2 + $0x10] sm:$0xff]  }
 0x289   :  { %4293 = vmatprep.subr.bf16.mxu0 %v4434_v14  ;;  %4409 = vmatprep.subr.bf16.mxu1 %v4434_v14 }
 0x28a   :  { %v1833_v62 = vcombine.high %v5667_v6, %v5707_v43  ;;  %v1834_v18 = vcombine.low %v5670_v38, %v5710_v56  ;;  %v1835_v23 = vcombine.high %v5670_v38, %v5710_v56  ;;  %4294 = vmatpush3.bf16.msra.mxu0 %v4434_v14  ;;  %4413 = vmatpush3.bf16.msra.mxu1 %v4434_v14  ;;  %v4437_v14 = vld [vmem:[%s6258_s2 + $0x18] sm:$0xff]   ;;  %s4781_s2 = smov 16  }
 0x28b   :  { %4295 = vmatprep.subr.bf16.mxu0 %v4435_v58  ;;  %4410 = vmatprep.subr.bf16.mxu1 %v4435_v58  ;;  %v6301_v7 = vcombine.low %v5677_v48, %v5715_v59  ;;  %v6314_v50 = vcombine.high %v5721_v20, %v5734_v37 }
 0x28e   :  { %4296 = vmatpush3.bf16.msra.mxu0 %v4435_v58  ;;  %4414 = vmatpush3.bf16.msra.mxu1 %v4435_v58 }
 0x28f   :  { %4297 = vmatprep.subr.bf16.mxu0 %v4436_v51  ;;  %4411 = vmatprep.subr.bf16.mxu1 %v4436_v51 }
 0x292   :  { %4298 = vmatpush3.bf16.msra.mxu0 %v4436_v51  ;;  %4415 = vmatpush3.bf16.msra.mxu1 %v4436_v51 }
 0x293   :  { %4299 = vmatprep.subr.bf16.mxu0 %v4437_v14  ;;  %4412 = vmatprep.subr.bf16.mxu1 %v4437_v14 }
 0x296   :  { %4300 = vmatpush3.bf16.msra.mxu0 %v4437_v14  ;;  %4416 = vmatpush3.bf16.msra.mxu1 %v4437_v14 }
 0x31a   :  { %v2042_v8 = vpop.f32.mrb[32].mxu0 }
 0x31b   :  { %v4201_v30 = vpop.f32.mrb[33].mxu0 }
 0x31c   :  { %v2045_v3 = vpop.f32.mrb[34].mxu0 }
 0x31d   :  { %v2709_v58 = vpack.c.bf16 %v2045_v3, %v2042_v8  ;;  %v4202_v53 = vpop.f32.mrb[35].mxu0 }
 0x31f   :  { %v2086_v5 = vpop.f32.mrb[32].mxu1  ;;  %2741 = vrot.lane.b32.xlu0 %v2709_v58, %s4780_s20 }
 0x320   :  { %v4207_v2 = vpop.f32.mrb[33].mxu1 }
 0x321   :  { %v2089_v13 = vpop.f32.mrb[34].mxu1 }
 0x322   :  { %v2710_v51 = vpack.c.bf16 %v2089_v13, %v2086_v5  ;;  %v4208_v54 = vpop.f32.mrb[35].mxu1 }
 0x323   :  { %v2130_v49 = vpop.f32.mrb[36].mxu0 }
 0x324   :  { %2743 = vrot.lane.b32.xlu1 %v2710_v51, %s4780_s20  ;;  %v4213_v21 = vpop.f32.mrb[37].mxu0 }
 0x325   :  { %v2133_v19 = vpop.f32.mrb[38].mxu0 }
 0x326   :  { %v2711_v31 = vpack.c.bf16 %v2133_v19, %v2130_v49  ;;  %v4214_v14 = vpop.f32.mrb[39].mxu0 }
 0x327   :  { %v2174_v17 = vpop.f32.mrb[36].mxu1 }
 0x328   :  { %v4219_v30 = vpop.f32.mrb[37].mxu1  ;;  %2745 = vrot.lane.b32.xlu1 %v2711_v31, %s4780_s20 }
 0x329   :  { %v2177_v3 = vpop.f32.mrb[38].mxu1 }
 0x32a   :  { %v2712_v8 = vpack.c.bf16 %v2177_v3, %v2174_v17  ;;  %v4220_v2 = vpop.f32.mrb[39].mxu1 }
 0x32b   :  { %v2218_v53 = vpop.f32.mrb[40].mxu0 }
 0x32c   :  { %2747 = vrot.lane.b32.xlu1 %v2712_v8, %s4780_s20  ;;  %v4225_v58 = vpop.f32.mrb[41].mxu0 }
 0x32d   :  { %v2221_v13 = vpop.f32.mrb[42].mxu0 }
 0x32e   :  { %v2713_v5 = vpack.c.bf16 %v2221_v13, %v2218_v53  ;;  %v4226_v54 = vpop.f32.mrb[43].mxu0 }
 0x32f   :  { %v2262_v32 = vpop.f32.mrb[40].mxu1 }
 0x330   :  { %v4231_v51 = vpop.f32.mrb[41].mxu1  ;;  %2749 = vrot.lane.b32.xlu0 %v2713_v5, %s4780_s20 }
 0x331   :  { %v2265_v49 = vpop.f32.mrb[42].mxu1 }
 0x332   :  { %v2714_v21 = vpack.c.bf16 %v2265_v49, %v2262_v32  ;;  %v4232_v19 = vpop.f32.mrb[43].mxu1 }
 0x333   :  { %v2306_v14 = vpop.f32.mrb[44].mxu0 }
 0x334   :  { %2751 = vrot.lane.b32.xlu1 %v2714_v21, %s4780_s20  ;;  %v4237_v31 = vpop.f32.mrb[45].mxu0 }
 0x335   :  { %v2309_v17 = vpop.f32.mrb[46].mxu0 }
 0x336   :  { %v2715_v30 = vpack.c.bf16 %v2309_v17, %v2306_v14  ;;  %v4238_v3 = vpop.f32.mrb[47].mxu0 }
 0x337   :  { %v2350_v2 = vpop.f32.mrb[44].mxu1 }
 0x338   :  { %v4243_v8 = vpop.f32.mrb[45].mxu1  ;;  %2753 = vrot.lane.b32.xlu0 %v2715_v30, %s4780_s20 }
 0x339   :  { %v2353_v53 = vpop.f32.mrb[46].mxu1 }
 0x33a   :  { %v2716_v58 = vpack.c.bf16 %v2353_v53, %v2350_v2  ;;  %v4244_v13 = vpop.f32.mrb[47].mxu1 }
 0x33b   :  { %v2394_v54 = vpop.f32.mrb[48].mxu0 }
 0x33c   :  { %2755 = vrot.lane.b32.xlu1 %v2716_v58, %s4780_s20  ;;  %v4249_v5 = vpop.f32.mrb[49].mxu0 }
 0x33d   :  { %v2397_v32 = vpop.f32.mrb[50].mxu0 }
 0x33e   :  { %v2717_v51 = vpack.c.bf16 %v2397_v32, %v2394_v54  ;;  %v4250_v49 = vpop.f32.mrb[51].mxu0 }
 0x33f   :  { %v2438_v19 = vpop.f32.mrb[48].mxu1 }
 0x340   :  { %v4255_v21 = vpop.f32.mrb[49].mxu1  ;;  %2757 = vrot.lane.b32.xlu0 %v2717_v51, %s4780_s20 }
 0x341   :  { %v2441_v14 = vpop.f32.mrb[50].mxu1 }
 0x342   :  { %v2718_v31 = vpack.c.bf16 %v2441_v14, %v2438_v19  ;;  %v4256_v17 = vpop.f32.mrb[51].mxu1 }
 0x343   :  { %v2482_v3 = vpop.f32.mrb[52].mxu0 }
 0x344   :  { %2759 = vrot.lane.b32.xlu1 %v2718_v31, %s4780_s20  ;;  %v4261_v30 = vpop.f32.mrb[53].mxu0 }
 0x345   :  { %v2485_v2 = vpop.f32.mrb[54].mxu0 }
 0x346   :  { %v2719_v8 = vpack.c.bf16 %v2485_v2, %v2482_v3  ;;  %v4262_v53 = vpop.f32.mrb[55].mxu0 }
 0x347   :  { %v2526_v13 = vpop.f32.mrb[52].mxu1 }
 0x348   :  { %v4267_v58 = vpop.f32.mrb[53].mxu1  ;;  %2761 = vrot.lane.b32.xlu0 %v2719_v8, %s4780_s20 }
 0x349   :  { %v2529_v54 = vpop.f32.mrb[54].mxu1 }
 0x34a   :  { %v2720_v5 = vpack.c.bf16 %v2529_v54, %v2526_v13  ;;  %v4268_v32 = vpop.f32.mrb[55].mxu1 }
 0x34b   :  { %v2570_v49 = vpop.f32.mrb[56].mxu0 }
 0x34c   :  { %2763 = vrot.lane.b32.xlu1 %v2720_v5, %s4780_s20  ;;  %v4273_v51 = vpop.f32.mrb[57].mxu0 }
 0x34d   :  { %v2573_v19 = vpop.f32.mrb[58].mxu0 }
 0x34e   :  { %v2721_v21 = vpack.c.bf16 %v2573_v19, %v2570_v49  ;;  %v4274_v14 = vpop.f32.mrb[59].mxu0 }
 0x34f   :  { %v2614_v17 = vpop.f32.mrb[56].mxu1 }
 0x350   :  { %v4279_v31 = vpop.f32.mrb[57].mxu1  ;;  %2765 = vrot.lane.b32.xlu0 %v2721_v21, %s4780_s20  ;;  %v6322_v21 = vld [vmem:[#allocation20_spill] sm:$0xff] }
 0x351   :  { %v2617_v3 = vpop.f32.mrb[58].mxu1  ;;  %v4439_v31 = vld [vmem:[%s6260_s4 + $0x8] sm:$0xff]  }
 0x352   :  { %v2722_v30 = vpack.c.bf16 %v2617_v3, %v2614_v17  ;;  %v4280_v2 = vpop.f32.mrb[59].mxu1  ;;  %v6323_v3 = vld [vmem:[#allocation21_spill] sm:$0xff] }
 0x353   :  { %v2658_v53 = vpop.f32.mrb[60].mxu0 }
 0x354   :  { %2767 = vrot.lane.b32.xlu1 %v2722_v30, %s4780_s20  ;;  %v4285_v8 = vpop.f32.mrb[61].mxu0 }
 0x355   :  { %v2661_v13 = vpop.f32.mrb[62].mxu0  ;;  %v6324_v8 = vld [vmem:[#allocation22_spill] sm:$0xff] }
 0x356   :  { %v2723_v58 = vpack.c.bf16 %v2661_v13, %v2658_v53  ;;  %v4286_v54 = vpop.f32.mrb[63].mxu0  ;;  %v4440_v53 = vld [vmem:[%s6260_s4 + $0x10] sm:$0xff]  }
 0x357   :  { %v2702_v32 = vpop.f32.mrb[60].mxu1  ;;  %v6325_v54 = vld [vmem:[#allocation23_spill] sm:$0xff] }
 0x358   :  { %v4291_v5 = vpop.f32.mrb[61].mxu1  ;;  %2769 = vrot.lane.b32.xlu0 %v2723_v58, %s4780_s20 }
 0x359   :  { %v2705_v49 = vpop.f32.mrb[62].mxu1 }
 0x35a   :  { %v2724_v51 = vpack.c.bf16 %v2705_v49, %v2702_v32  ;;  %v4292_v19 = vpop.f32.mrb[63].mxu1  ;;  %v6326_v49 = vld [vmem:[#allocation24_spill] sm:$0xff] }
 0x35c   :  { %2771 = vrot.lane.b32.xlu1 %v2724_v51, %s4780_s20  ;;  %1842 = vrot.lane.b32.xlu0 %v1425_v29, %s4781_s2  ;;  %v6304_v29 = vcombine.high %v5464_v35, %v5541_v0  ;;  %v4438_v35 = vld [vmem:[%s6260_s4] sm:$0xff]   ;;  %v6311_v0 = vcombine.high %v5674_v27, %v5694_v34 }
 0x35d   :  { %4333 = vmatprep.subr.bf16.mxu1 %v4438_v35  ;;  %v6318_v34 = vld [vmem:[#allocation16_spill] sm:$0xff] }
 0x360   :  { %1844 = vrot.lane.b32.xlu1 %v1561_v4, %s4781_s2  ;;  %1898 = vrot.lane.b32.xlu0 %v1697_v16, %s4781_s2  ;;  %v6312_v16 = vcombine.high %v5610_v52, %v5585_v47  ;;  %v6316_v47 = vld [vmem:[#allocation14_spill] sm:$0xff] }
 0x364   :  { %1900 = vrot.lane.b32.xlu1 %v1833_v62, %s4781_s2  ;;  %1850 = vrot.lane.b32.xlu0 %v1426_v45, %s4780_s20  ;;  %v6305_v45 = vcombine.high %v5677_v48, %v5715_v59  ;;  %v6317_v48 = vld [vmem:[#allocation15_spill] sm:$0xff]  ;;  %v6320_v59 = vld [vmem:[#allocation18_spill] sm:$0xff] }
 0x368   :  { %1852 = vrot.lane.b32.xlu1 %v1562_v33, %s4780_s20  ;;  %1906 = vrot.lane.b32.xlu0 %v1698_v10, %s4780_s20 }
 0x36c   :  { %1908 = vrot.lane.b32.xlu1 %v1834_v18, %s4780_s20  ;;  %1858 = vrot.lane.b32.xlu0 %v1427_v42, %s4782_s21  ;;  %v6306_v42 = vcombine.low %v5452_v22, %v5533_v11  ;;  %v6315_v11 = vld [vmem:[#allocation13_spill] sm:$0xff]  ;;  %v6321_v18 = vld [vmem:[#allocation19_spill] sm:$0xff] }
 0x370   :  { %1860 = vrot.lane.b32.xlu1 %v1563_v44, %s4782_s21  ;;  %1914 = vrot.lane.b32.xlu0 %v1699_v12, %s4782_s21  ;;  %v6313_v12 = vld [vmem:[#allocation12_spill] sm:$0xff]  ;;  %v6319_v44 = vld [vmem:[#allocation17_spill] sm:$0xff] }
 0x374   :  { %1916 = vrot.lane.b32.xlu1 %v1835_v23, %s4782_s21  ;;  %1866 = vrot.lane.b32.xlu0 %v1428_v61, %s4783_s22  ;;  %v6309_v61 = vcombine.low %v5721_v20, %v5734_v37 }
 0x378   :  { %1868 = vrot.lane.b32.xlu1 %v1564_v24, %s4783_s22  ;;  %1922 = vrot.lane.b32.xlu0 %v1700_v60, %s4783_s22 }
 0x37c   :  { %1924 = vrot.lane.b32.xlu1 %v6301_v7, %s4783_s22  ;;  %1874 = vrot.lane.b32.xlu0 %v6302_v26, %s4784_s23  ;;  %v6327_v7 = vld [vmem:[#allocation25_spill] sm:$0xff] }
 0x380   :  { %1876 = vrot.lane.b32.xlu1 %v6303_v57, %s4784_s23  ;;  %1930 = vrot.lane.b32.xlu0 %v6304_v29, %s4784_s23  ;;  %v6328_v29 = vld [vmem:[#allocation26_spill] sm:$0xff] }
 0x384   :  { %1932 = vrot.lane.b32.xlu1 %v6305_v45, %s4784_s23  ;;  %1882 = vrot.lane.b32.xlu0 %v6306_v42, %s4785_s24 }
 0x388   :  { %1884 = vrot.lane.b32.xlu1 %v6307_v36, %s4785_s24  ;;  %1938 = vrot.lane.b32.xlu0 %v6308_v9, %s4785_s24  ;;  %v6329_v9 = vld [vmem:[#allocation27_spill] sm:$0xff] }
 0x38c   :  { %1940 = vrot.lane.b32.xlu1 %v6309_v61, %s4785_s24  ;;  %1890 = vrot.lane.b32.xlu0 %v6310_v63, %s4786_s27 }
 0x390   :  { %1892 = vrot.lane.b32.xlu1 %v6311_v0, %s4786_s27  ;;  %1946 = vrot.lane.b32.xlu0 %v6312_v16, %s4786_s27 }
 0x391   :  { %v2742_v10 = vpop.permute.xlu0 %2741 }
 0x392   :  { %v2774_v60 = vsel %vm158_vm1, %v6313_v12, %v2742_v10 }
 0x393   :  { %4301 = vmatprep.mubr.msk.bf16.mxu0 %vm1959_vm3, %v2774_v60 }
 0x394   :  { %1948 = vrot.lane.b32.xlu1 %v6314_v50, %s4786_s27 }
 0x396   :  { %v2744_v22 = vpop.permute.xlu1 %2743 }
 0x397   :  { %v2776_v46 = vsel %vm158_vm1, %v6315_v11, %v2744_v22 }
 0x398   :  { %4302 = vmatmul.mubr.msk.bf16.vlgmr.msra.gmra.mrb[64].mxu0 %vm1959_vm3, %v2776_v46 }
 0x39a   :  { %v2746_v38 = vpop.permute.xlu1 %2745 }
 0x39b   :  { %v2778_v52 = vsel %vm158_vm1, %v6316_v47, %v2746_v38 }
 0x39c   :  { %4305 = vmatprep.mubr.msk.bf16.mxu0 %vm1959_vm3, %v2778_v52 }
 0x39e   :  { %v2748_v27 = vpop.permute.xlu1 %2747 }
 0x39f   :  { %v2780_v28 = vsel %vm158_vm1, %v6317_v48, %v2748_v27 }
 0x3a0   :  { %4306 = vmatmul.mubr.msk.bf16.gmra.mrb[68].mxu0 %vm1959_vm3, %v2780_v28 }
 0x3a2   :  { %v2750_v55 = vpop.permute.xlu0 %2749 }
 0x3a3   :  { %v2782_v4 = vsel %vm158_vm1, %v6318_v34, %v2750_v55  ;;  %v4441_v34 = vld [vmem:[%s6260_s4 + $0x18] sm:$0xff]  }
 0x3a4   :  { %4309 = vmatprep.mubr.msk.bf16.mxu0 %vm1959_vm3, %v2782_v4 }
 0x3a6   :  { %v2752_v33 = vpop.permute.xlu1 %2751 }
 0x3a7   :  { %v2784_v24 = vsel %vm158_vm1, %v6319_v44, %v2752_v33  ;;  %v6330_v44 = vcombine.low %v5438_v41, %v5483_v1  ;;  %v6332_v41 = vcombine.low %v5449_v15, %v5527_v40 }
 0x3a8   :  { %4310 = vmatmul.mubr.msk.bf16.gmra.mrb[72].mxu0 %vm1959_vm3, %v2784_v24 }
 0x3aa   :  { %v2754_v56 = vpop.permute.xlu0 %2753 }
 0x3ab   :  { %v2786_v20 = vsel %vm158_vm1, %v6320_v59, %v2754_v56 }
 0x3ac   :  { %4313 = vmatprep.mubr.msk.bf16.mxu0 %vm1959_vm3, %v2786_v20 }
 0x3ae   :  { %v2756_v62 = vpop.permute.xlu1 %2755 }
 0x3af   :  { %v2788_v23 = vsel %vm158_vm1, %v6321_v18, %v2756_v62 }
 0x3b0   :  { %4314 = vmatmul.mubr.msk.bf16.gmra.mrb[76].mxu0 %vm1959_vm3, %v2788_v23  ;;  %v6331_v23 = vcombine.low %v5648_v25, %v5680_v39 }
 0x3b2   :  { %v2758_v37 = vpop.permute.xlu0 %2757 }
 0x3b3   :  { %v2790_v14 = vsel %vm158_vm1, %v6322_v21, %v2758_v37 }
 0x3b4   :  { %4317 = vmatprep.mubr.msk.bf16.mxu1 %vm1959_vm3, %v2790_v14 }
 0x3b6   :  { %v2760_v17 = vpop.permute.xlu1 %2759 }
 0x3b7   :  { %v2792_v30 = vsel %vm158_vm1, %v6323_v3, %v2760_v17 }
 0x3b8   :  { %4318 = vmatmul.mubr.msk.bf16.vlgmr.msra.gmra.mrb[64].mxu1 %vm1959_vm3, %v2792_v30 }
 0x3b9   :  { %4334 = vmatpush3.bf16.msra.mxu1 %v4438_v35 }
 0x3ba   :  { %v2762_v2 = vpop.permute.xlu0 %2761  ;;  %4335 = vmatprep.subr.bf16.mxu1 %v4439_v31 }
 0x3bb   :  { %v2794_v13 = vsel %vm158_vm1, %v6324_v8, %v2762_v2 }
 0x3bc   :  { %4321 = vmatprep.mubr.msk.bf16.mxu1 %vm1959_vm3, %v2794_v13 }
 0x3bd   :  { %4336 = vmatpush3.bf16.msra.mxu1 %v4439_v31 }
 0x3be   :  { %v2764_v58 = vpop.permute.xlu1 %2763  ;;  %4337 = vmatprep.subr.bf16.mxu1 %v4440_v53 }
 0x3bf   :  { %v2796_v32 = vsel %vm158_vm1, %v6325_v54, %v2764_v58 }
 0x3c0   :  { %4322 = vmatmul.mubr.msk.bf16.gmra.mrb[68].mxu1 %vm1959_vm3, %v2796_v32 }
 0x3c1   :  { %4338 = vmatpush3.bf16.msra.mxu1 %v4440_v53  ;;  %v6333_v53 = vcombine.low %v5667_v6, %v5707_v43 }
 0x3c2   :  { %v2766_v5 = vpop.permute.xlu0 %2765  ;;  %4339 = vmatprep.subr.bf16.mxu1 %v4441_v34 }
 0x3c3   :  { %v2798_v51 = vsel %vm158_vm1, %v6326_v49, %v2766_v5 }
 0x3c4   :  { %4325 = vmatprep.mubr.msk.bf16.mxu1 %vm1959_vm3, %v2798_v51 }
 0x3c5   :  { %4340 = vmatpush3.bf16.msra.mxu1 %v4441_v34 }
 0x3c6   :  { %v2768_v19 = vpop.permute.xlu1 %2767 }
 0x3c7   :  { %v2800_v26 = vsel %vm158_vm1, %v6327_v7, %v2768_v19 }
 0x3c8   :  { %4326 = vmatmul.mubr.msk.bf16.gmra.mrb[72].mxu1 %vm1959_vm3, %v2800_v26 }
 0x3ca   :  { %v2770_v57 = vpop.permute.xlu0 %2769 }
 0x3cb   :  { %v2802_v45 = vsel %vm158_vm1, %v6328_v29, %v2770_v57 }
 0x3cc   :  { %4329 = vmatprep.mubr.msk.bf16.mxu1 %vm1959_vm3, %v2802_v45 }
 0x3ce   :  { %v2772_v42 = vpop.permute.xlu1 %2771  ;;  %v1843_v36 = vpop.permute.xlu0 %1842 }
 0x3cf   :  { %v2804_v35 = vsel %vm158_vm1, %v6329_v9, %v2772_v42  ;;  %v1952_v24 = vsel %vm943_vm2, %v6330_v44, %v1843_v36  ;;  %v4442_v42 = vld [vmem:[%s6262_s6] sm:$0xff]   ;;  %v4443_v36 = vld [vmem:[%s6262_s6 + $0x8] sm:$0xff]  }
 0x3d0   :  { %4330 = vmatmul.mubr.msk.bf16.gmra.mrb[76].mxu1 %vm1959_vm3, %v2804_v35  ;;  %4373 = vmatprep.subr.bf16.mxu0 %v4442_v42  ;;  %v5975_v9 = vld [vmem:[%s6259_s3] ss:$0 sm:$0xff] }
 0x3d1   :  { %4374 = vmatpush3.bf16.msra.mxu0 %v4442_v42 }
 0x3d2   :  { %v1845_v61 = vpop.permute.xlu1 %1844  ;;  %v1899_v63 = vpop.permute.xlu0 %1898  ;;  %4375 = vmatprep.subr.bf16.mxu0 %v4443_v36 }
 0x3d3   :  { %v1953_v37 = vsel %vm943_vm2, %v6331_v23, %v1845_v61  ;;  %v1971_v1 = vsel %vm943_vm2, %v6332_v41, %v1899_v63 }
 0x3d5   :  { %4376 = vmatpush3.bf16.msra.mxu0 %v4443_v36 }
 0x3d6   :  { %v1901_v0 = vpop.permute.xlu1 %1900  ;;  %v1851_v16 = vpop.permute.xlu0 %1850 }
 0x3d7   :  { %v1954_v56 = vsel %vm158_vm1, %v1952_v24, %v1851_v16  ;;  %v1972_v8 = vsel %vm943_vm2, %v6333_v53, %v1901_v0 }
 0x3da   :  { %v1853_v10 = vpop.permute.xlu1 %1852  ;;  %v1907_v12 = vpop.permute.xlu0 %1906 }
 0x3db   :  { %v1955_v14 = vsel %vm158_vm1, %v1953_v37, %v1853_v10  ;;  %v1973_v17 = vsel %vm158_vm1, %v1971_v1, %v1907_v12 }
 0x3de   :  { %v1909_v60 = vpop.permute.xlu1 %1908  ;;  %v1859_v50 = vpop.permute.xlu0 %1858 }
 0x3df   :  { %v1957_v62 = vsel %vm1956_vm4, %v1954_v56, %v1859_v50  ;;  %v1974_v54 = vsel %vm158_vm1, %v1972_v8, %v1909_v60 }
 0x3e2   :  { %v1861_v22 = vpop.permute.xlu1 %1860  ;;  %v1915_v11 = vpop.permute.xlu0 %1914 }
 0x3e3   :  { %v1958_v2 = vsel %vm1956_vm4, %v1955_v14, %v1861_v22  ;;  %v1975_v25 = vsel %vm1956_vm4, %v1973_v17, %v1915_v11 }
 0x3e6   :  { %v1917_v46 = vpop.permute.xlu1 %1916  ;;  %v1867_v38 = vpop.permute.xlu0 %1866 }
 0x3e7   :  { %v1960_v18 = vsel %vm1959_vm3, %v1957_v62, %v1867_v38  ;;  %v1976_v19 = vsel %vm1956_vm4, %v1974_v54, %v1917_v46 }
 0x3ea   :  { %v1869_v47 = vpop.permute.xlu1 %1868  ;;  %v1923_v52 = vpop.permute.xlu0 %1922 }
 0x3eb   :  { %v1961_v15 = vsel %vm1959_vm3, %v1958_v2, %v1869_v47  ;;  %v1977_v40 = vsel %vm1959_vm3, %v1975_v25, %v1923_v52 }
 0x3ee   :  { %v1925_v27 = vpop.permute.xlu1 %1924  ;;  %v1875_v48 = vpop.permute.xlu0 %1874 }
 0x3ef   :  { %v1963_v21 = vsel %vm1962_vm5, %v1960_v18, %v1875_v48  ;;  %v1978_v43 = vsel %vm1959_vm3, %v1976_v19, %v1925_v27 }
 0x3f2   :  { %v1877_v28 = vpop.permute.xlu1 %1876  ;;  %v1931_v55 = vpop.permute.xlu0 %1930 }
 0x3f3   :  { %v1964_v13 = vsel %vm1962_vm5, %v1961_v15, %v1877_v28  ;;  %v1979_v58 = vsel %vm1962_vm5, %v1977_v40, %v1931_v55 }
 0x3f6   :  { %v1933_v4 = vpop.permute.xlu1 %1932  ;;  %v1883_v33 = vpop.permute.xlu0 %1882 }
 0x3f7   :  { %v1966_v31 = vsel %vm1965_vm6, %v1963_v21, %v1883_v33  ;;  %v1980_v26 = vsel %vm1962_vm5, %v1978_v43, %v1933_v4 }
 0x3fa   :  { %v1885_v59 = vpop.permute.xlu1 %1884  ;;  %v1939_v20 = vpop.permute.xlu0 %1938 }
 0x3fb   :  { %v1967_v32 = vsel %vm1965_vm6, %v1964_v13, %v1885_v59  ;;  %v1981_v5 = vsel %vm1965_vm6, %v1979_v58, %v1939_v20 }
 0x3fe   :  { %v1941_v3 = vpop.permute.xlu1 %1940  ;;  %v1891_v30 = vpop.permute.xlu0 %1890 }
 0x3ff   :  { %v1969_v39 = vsel %vm1968_vm7, %v1966_v31, %v1891_v30  ;;  %v1982_v57 = vsel %vm1965_vm6, %v1980_v26, %v1941_v3 }
 0x400   :  { %1985 = vst [vmem:[#allocation8] sm:$0xff] %v1969_v39 }
 0x402   :  { %v1893_v49 = vpop.permute.xlu1 %1892  ;;  %v1947_v51 = vpop.permute.xlu0 %1946 }
 0x403   :  { %v1970_v7 = vsel %vm1968_vm7, %v1967_v32, %v1893_v49  ;;  %v1983_v6 = vsel %vm1968_vm7, %v1981_v5, %v1947_v51 }
 0x404   :  { %1987 = vst [vmem:[#allocation8 + $0x10] sm:$0xff] %v1970_v7  ;;  %1986 = vst [vmem:[#allocation8 + $0x8] sm:$0xff] %v1983_v6 }
 0x406   :  { %v1949_v29 = vpop.permute.xlu1 %1948 }
 0x407   :  { %v1984_v45 = vsel %vm1968_vm7, %v1982_v57, %v1949_v29 }
 0x408   :  { %1988 = vst [vmem:[#allocation8 + $0x18] sm:$0xff] %v1984_v45 }
 0x46b   :  { %v4303_v35 = vpop.f32.mrb[64].mxu0 }
 0x46c   :  { %v2919_v61 = vadd.f32 %v4303_v35, %v5975_v9  ;;  %v2910_v63 = vpop.f32.mrb[65].mxu0 }
 0x46d   :  { %v2911_v0 = vadd.f32 %v5975_v9, %v2910_v63  ;;  %v4304_v16 = vpop.f32.mrb[66].mxu0 }
 0x46e   :  { %v2922_v10 = vadd.f32 %v4304_v16, %v5975_v9  ;;  %v2913_v12 = vpop.f32.mrb[67].mxu0  ;;  %v3039_v50 = vmax.f32 %v2919_v61, 0.0 }
 0x46f   :  { %v2914_v60 = vadd.f32 %v5975_v9, %v2913_v12  ;;  %v3037_v11 = vmax.f32 %v2911_v0, 0.0 }
 0x470   :  { %v3040_v22 = vmax.f32 %v2922_v10, 0.0 }
 0x471   :  { %v3038_v46 = vmax.f32 %v2914_v60, 0.0 }
 0x472   :  { %v3070_v38 = vpack.c.bf16 %v3040_v22, %v3039_v50 }
 0x473   :  { %v3069_v47 = vpack.c.bf16 %v3038_v46, %v3037_v11  ;;  %v4307_v52 = vpop.f32.mrb[68].mxu0 }
 0x474   :  { %v2935_v27 = vadd.f32 %v4307_v52, %v5975_v9  ;;  %v2926_v48 = vpop.f32.mrb[69].mxu0 }
 0x475   :  { %v2927_v28 = vadd.f32 %v5975_v9, %v2926_v48  ;;  %v4308_v55 = vpop.f32.mrb[70].mxu0  ;;  %4341 = vmatprep.mubr.msk.bf16.mxu1 %vm1959_vm3, %v3069_v47 }
 0x476   :  { %v2938_v34 = vadd.f32 %v4308_v55, %v5975_v9  ;;  %v2929_v4 = vpop.f32.mrb[71].mxu0  ;;  %4342 = vmatmul.mubr.msk.bf16.vlgmr.msra.gmra.mrb[80].mxu1 %vm1959_vm3, %v3070_v38  ;;  %v3043_v44 = vmax.f32 %v2935_v27, 0.0 }
 0x477   :  { %v2930_v33 = vadd.f32 %v5975_v9, %v2929_v4  ;;  %v3041_v56 = vmax.f32 %v2927_v28, 0.0 }
 0x478   :  { %v3044_v24 = vmax.f32 %v2938_v34, 0.0 }
 0x479   :  { %v3042_v59 = vmax.f32 %v2930_v33, 0.0 }
 0x47a   :  { %v3072_v20 = vpack.c.bf16 %v3044_v24, %v3043_v44 }
 0x47b   :  { %v3071_v62 = vpack.c.bf16 %v3042_v59, %v3041_v56  ;;  %v4311_v18 = vpop.f32.mrb[72].mxu0 }
 0x47c   :  { %v2951_v23 = vadd.f32 %v4311_v18, %v5975_v9  ;;  %v2942_v37 = vpop.f32.mrb[73].mxu0 }
 0x47d   :  { %v2943_v41 = vadd.f32 %v5975_v9, %v2942_v37  ;;  %v4312_v1 = vpop.f32.mrb[74].mxu0  ;;  %4345 = vmatprep.mubr.msk.bf16.mxu1 %vm1959_vm3, %v3071_v62 }
 0x47e   :  { %v2954_v21 = vadd.f32 %v4312_v1, %v5975_v9  ;;  %v2945_v14 = vpop.f32.mrb[75].mxu0  ;;  %4346 = vmatmul.mubr.msk.bf16.gmra.mrb[84].mxu1 %vm1959_vm3, %v3072_v20  ;;  %v3047_v31 = vmax.f32 %v2951_v23, 0.0 }
 0x47f   :  { %v2946_v17 = vadd.f32 %v5975_v9, %v2945_v14  ;;  %v3045_v30 = vmax.f32 %v2943_v41, 0.0 }
 0x480   :  { %v3048_v3 = vmax.f32 %v2954_v21, 0.0 }
 0x481   :  { %v3046_v2 = vmax.f32 %v2946_v17, 0.0 }
 0x482   :  { %v3074_v25 = vpack.c.bf16 %v3048_v3, %v3047_v31 }
 0x483   :  { %v3073_v39 = vpack.c.bf16 %v3046_v2, %v3045_v30  ;;  %v4315_v15 = vpop.f32.mrb[76].mxu0 }
 0x484   :  { %v2967_v40 = vadd.f32 %v4315_v15, %v5975_v9  ;;  %v2958_v53 = vpop.f32.mrb[77].mxu0 }
 0x485   :  { %v2959_v8 = vadd.f32 %v5975_v9, %v2958_v53  ;;  %v4316_v13 = vpop.f32.mrb[78].mxu0  ;;  %4349 = vmatprep.mubr.msk.bf16.mxu1 %vm1959_vm3, %v3073_v39 }
 0x486   :  { %v2970_v58 = vadd.f32 %v4316_v13, %v5975_v9  ;;  %v2961_v54 = vpop.f32.mrb[79].mxu0  ;;  %4350 = vmatmul.mubr.msk.bf16.gmra.mrb[88].mxu1 %vm1959_vm3, %v3074_v25  ;;  %v3051_v5 = vmax.f32 %v2967_v40, 0.0 }
 0x487   :  { %v2962_v32 = vadd.f32 %v5975_v9, %v2961_v54  ;;  %v3049_v51 = vmax.f32 %v2959_v8, 0.0 }
 0x488   :  { %v3052_v49 = vmax.f32 %v2970_v58, 0.0 }
 0x489   :  { %v3050_v19 = vmax.f32 %v2962_v32, 0.0  ;;  %v6028_v32 = vld [vmem:[%s6261_s5] ss:$0 sm:$0xff]  ;;  %s4787_s5 = smov [#allocation8]  }
 0x48a   :  { %v3076_v7 = vpack.c.bf16 %v3052_v49, %v3051_v5  ;;  %s3838_s16 = sshll.u32 %s4787_s5, 4  ;;  %s3839_s16 = int_to_ptr.vmem [resolvable:$true] %s3838_s16 }
 0x48b   :  { %v3075_v6 = vpack.c.bf16 %v3050_v19, %v3049_v51  ;;  %v4319_v43 = vpop.f32.mrb[64].mxu1  ;;  %s4744_s17 = scalar_lea.vmem %s3839_s16, 512  ;;  %p4749_p3 = scmp.lt.s32.totalorder %s3839_s16, %s3839_s16 }
 0x48c   :  { %v2983_v26 = vadd.f32 %v4319_v43, %v5975_v9  ;;  %v2974_v57 = vpop.f32.mrb[65].mxu1  ;;  %p4745_p2 = scmp.ne.s32.totalorder %s3839_s16, %s4744_s17  ;;  %p4750_p4 = scmp.lt.s32.totalorder %s4744_s17, %s4744_s17 }
 0x48d   :  { %v2975_v29 = vadd.f32 %v5975_v9, %v2974_v57  ;;  %v4320_v45 = vpop.f32.mrb[66].mxu1  ;;  %4353 = vmatprep.mubr.msk.bf16.mxu1 %vm1959_vm3, %v3075_v6 }
 0x48e   :  { %v2986_v42 = vadd.f32 %v4320_v45, %v5975_v9  ;;  %v2977_v36 = vpop.f32.mrb[67].mxu1  ;;  %4354 = vmatmul.mubr.msk.bf16.gmra.mrb[92].mxu1 %vm1959_vm3, %v3076_v7  ;;  %v3055_v61 = vmax.f32 %v2983_v26, 0.0  ;;  %p4751_p5 = por %p4750_p4, %p4749_p3 }
 0x48f   :  { %v2978_v35 = vadd.f32 %v5975_v9, %v2977_v36  ;;  %v3053_v0 = vmax.f32 %v2975_v29, 0.0 }
 0x490   :  { %v3056_v63 = vmax.f32 %v2986_v42, 0.0  ;;  %p4752_p6 = pnand %p4751_p5, %p4745_p2 }
 0x491   :  { %v3054_v16 = vmax.f32 %v2978_v35, 0.0 }
 0x492   :  { %v3078_v10 = vpack.c.bf16 %v3056_v63, %v3055_v61 }
 0x493   :  { %v3077_v12 = vpack.c.bf16 %v3054_v16, %v3053_v0  ;;  %v4323_v60 = vpop.f32.mrb[68].mxu1 }
 0x494   :  { %v2999_v50 = vadd.f32 %v4323_v60, %v5975_v9  ;;  %v2990_v22 = vpop.f32.mrb[69].mxu1 }
 0x495   :  { %v2991_v11 = vadd.f32 %v5975_v9, %v2990_v22  ;;  %v4324_v46 = vpop.f32.mrb[70].mxu1  ;;  %4357 = vmatprep.mubr.msk.bf16.mxu1 %vm1959_vm3, %v3077_v12 }
 0x496   :  { %v3002_v38 = vadd.f32 %v4324_v46, %v5975_v9  ;;  %v2993_v47 = vpop.f32.mrb[71].mxu1  ;;  %4358 = vmatmul.mubr.msk.bf16.gmra.mrb[96].mxu1 %vm1959_vm3, %v3078_v10  ;;  %v3059_v27 = vmax.f32 %v2999_v50, 0.0 }
 0x497   :  { %v2994_v52 = vadd.f32 %v5975_v9, %v2993_v47  ;;  %v3057_v28 = vmax.f32 %v2991_v11, 0.0 }
 0x498   :  { %v3060_v48 = vmax.f32 %v3002_v38, 0.0 }
 0x499   :  { %v3058_v55 = vmax.f32 %v2994_v52, 0.0 }
 0x49a   :  { %v3080_v34 = vpack.c.bf16 %v3060_v48, %v3059_v27 }
 0x49b   :  { %v3079_v4 = vpack.c.bf16 %v3058_v55, %v3057_v28  ;;  %v4327_v33 = vpop.f32.mrb[72].mxu1 }
 0x49c   :  { %v3015_v44 = vadd.f32 %v4327_v33, %v5975_v9  ;;  %v3006_v24 = vpop.f32.mrb[73].mxu1 }
 0x49d   :  { %v3007_v56 = vadd.f32 %v5975_v9, %v3006_v24  ;;  %v4328_v59 = vpop.f32.mrb[74].mxu1  ;;  %4361 = vmatprep.mubr.msk.bf16.mxu1 %vm1959_vm3, %v3079_v4 }
 0x49e   :  { %v3018_v20 = vadd.f32 %v4328_v59, %v5975_v9  ;;  %v3009_v62 = vpop.f32.mrb[75].mxu1  ;;  %4362 = vmatmul.mubr.msk.bf16.gmra.mrb[100].mxu1 %vm1959_vm3, %v3080_v34  ;;  %v3063_v23 = vmax.f32 %v3015_v44, 0.0 }
 0x49f   :  { %v3010_v18 = vadd.f32 %v5975_v9, %v3009_v62  ;;  %v3061_v41 = vmax.f32 %v3007_v56, 0.0 }
 0x4a0   :  { %v3064_v37 = vmax.f32 %v3018_v20, 0.0 }
 0x4a1   :  { %v3062_v1 = vmax.f32 %v3010_v18, 0.0 }
 0x4a2   :  { %v3082_v21 = vpack.c.bf16 %v3064_v37, %v3063_v23 }
 0x4a3   :  { %v3081_v14 = vpack.c.bf16 %v3062_v1, %v3061_v41  ;;  %v4331_v17 = vpop.f32.mrb[76].mxu1 }
 0x4a4   :  { %v3031_v31 = vadd.f32 %v4331_v17, %v5975_v9  ;;  %v3022_v3 = vpop.f32.mrb[77].mxu1 }
 0x4a5   :  { %v3023_v30 = vadd.f32 %v5975_v9, %v3022_v3  ;;  %v4332_v2 = vpop.f32.mrb[78].mxu1  ;;  %4365 = vmatprep.mubr.msk.bf16.mxu1 %vm1959_vm3, %v3081_v14 }
 0x4a6   :  { %v3034_v25 = vadd.f32 %v4332_v2, %v5975_v9  ;;  %v3025_v39 = vpop.f32.mrb[79].mxu1  ;;  %4366 = vmatmul.mubr.msk.bf16.gmra.mrb[104].mxu1 %vm1959_vm3, %v3082_v21  ;;  %v3067_v40 = vmax.f32 %v3031_v31, 0.0 }
 0x4a7   :  { %v3026_v15 = vadd.f32 %v5975_v9, %v3025_v39  ;;  %v3065_v8 = vmax.f32 %v3023_v30, 0.0 }
 0x4a8   :  { %v3068_v53 = vmax.f32 %v3034_v25, 0.0 }
 0x4a9   :  { %v3066_v13 = vmax.f32 %v3026_v15, 0.0 }
 0x4aa   :  { %v3084_v58 = vpack.c.bf16 %v3068_v53, %v3067_v40 }
 0x4ab   :  { %v3083_v54 = vpack.c.bf16 %v3066_v13, %v3065_v8 }
 0x4ad   :  { %4369 = vmatprep.mubr.msk.bf16.mxu1 %vm1959_vm3, %v3083_v54 }
 0x4ae   :  { %4370 = vmatmul.mubr.msk.bf16.gmra.mrb[108].mxu1 %vm1959_vm3, %v3084_v58 }
 0x549   :  { %v4343_v5 = vpop.f32.mrb[80].mxu1 }
 0x54a   :  { %v3215_v49 = vadd.f32 %v4343_v5, %v6028_v32  ;;  %v3206_v51 = vpop.f32.mrb[81].mxu1 }
 0x54b   :  { %v3207_v9 = vadd.f32 %v6028_v32, %v3206_v51  ;;  %v4344_v19 = vpop.f32.mrb[82].mxu1 }
 0x54c   :  { %v3218_v7 = vadd.f32 %v4344_v19, %v6028_v32  ;;  %v3209_v6 = vpop.f32.mrb[83].mxu1  ;;  %v3335_v26 = vmax.f32 %v3215_v49, 0.0 }
 0x54d   :  { %v3210_v43 = vadd.f32 %v6028_v32, %v3209_v6  ;;  %v3333_v29 = vmax.f32 %v3207_v9, 0.0 }
 0x54e   :  { %v3336_v57 = vmax.f32 %v3218_v7, 0.0 }
 0x54f   :  { %v3334_v45 = vmax.f32 %v3210_v43, 0.0 }
 0x550   :  { %v3366_v42 = vpack.c.bf16 %v3336_v57, %v3335_v26 }
 0x551   :  { %v3365_v36 = vpack.c.bf16 %v3334_v45, %v3333_v29  ;;  %v4347_v35 = vpop.f32.mrb[84].mxu1 }
 0x552   :  { %v3231_v61 = vadd.f32 %v4347_v35, %v6028_v32  ;;  %v3222_v63 = vpop.f32.mrb[85].mxu1 }
 0x553   :  { %v3223_v0 = vadd.f32 %v6028_v32, %v3222_v63  ;;  %v4348_v16 = vpop.f32.mrb[86].mxu1  ;;  %4377 = vmatprep.mubr.msk.bf16.mxu0 %vm158_vm1, %v3365_v36 }
 0x554   :  { %v3234_v10 = vadd.f32 %v4348_v16, %v6028_v32  ;;  %v3225_v12 = vpop.f32.mrb[87].mxu1  ;;  %4378 = vmatmul.mubr.msk.bf16.vlgmr.msra.gmra.mrb[80].mxu0 %vm158_vm1, %v3366_v42  ;;  %v3339_v50 = vmax.f32 %v3231_v61, 0.0 }
 0x555   :  { %v3226_v60 = vadd.f32 %v6028_v32, %v3225_v12  ;;  %v3337_v11 = vmax.f32 %v3223_v0, 0.0 }
 0x556   :  { %v3340_v22 = vmax.f32 %v3234_v10, 0.0 }
 0x557   :  { %v3338_v46 = vmax.f32 %v3226_v60, 0.0 }
 0x558   :  { %v3368_v38 = vpack.c.bf16 %v3340_v22, %v3339_v50 }
 0x559   :  { %v3367_v47 = vpack.c.bf16 %v3338_v46, %v3337_v11  ;;  %v4351_v52 = vpop.f32.mrb[88].mxu1 }
 0x55a   :  { %v3247_v27 = vadd.f32 %v4351_v52, %v6028_v32  ;;  %v3238_v48 = vpop.f32.mrb[89].mxu1 }
 0x55b   :  { %v3239_v28 = vadd.f32 %v6028_v32, %v3238_v48  ;;  %v4352_v55 = vpop.f32.mrb[90].mxu1  ;;  %4381 = vmatprep.mubr.msk.bf16.mxu0 %vm158_vm1, %v3367_v47 }
 0x55c   :  { %v3250_v34 = vadd.f32 %v4352_v55, %v6028_v32  ;;  %v3241_v4 = vpop.f32.mrb[91].mxu1  ;;  %4382 = vmatmul.mubr.msk.bf16.gmra.mrb[84].mxu0 %vm158_vm1, %v3368_v38  ;;  %v3343_v44 = vmax.f32 %v3247_v27, 0.0 }
 0x55d   :  { %v3242_v33 = vadd.f32 %v6028_v32, %v3241_v4  ;;  %v3341_v56 = vmax.f32 %v3239_v28, 0.0 }
 0x55e   :  { %v3344_v24 = vmax.f32 %v3250_v34, 0.0 }
 0x55f   :  { %v3342_v59 = vmax.f32 %v3242_v33, 0.0 }
 0x560   :  { %v3370_v20 = vpack.c.bf16 %v3344_v24, %v3343_v44 }
 0x561   :  { %v3369_v62 = vpack.c.bf16 %v3342_v59, %v3341_v56  ;;  %v4355_v18 = vpop.f32.mrb[92].mxu1 }
 0x562   :  { %v3263_v23 = vadd.f32 %v4355_v18, %v6028_v32  ;;  %v3254_v37 = vpop.f32.mrb[93].mxu1 }
 0x563   :  { %v3255_v41 = vadd.f32 %v6028_v32, %v3254_v37  ;;  %v4356_v1 = vpop.f32.mrb[94].mxu1  ;;  %4385 = vmatprep.mubr.msk.bf16.mxu0 %vm158_vm1, %v3369_v62 }
 0x564   :  { %v3266_v21 = vadd.f32 %v4356_v1, %v6028_v32  ;;  %v3257_v14 = vpop.f32.mrb[95].mxu1  ;;  %4386 = vmatmul.mubr.msk.bf16.gmra.mrb[88].mxu0 %vm158_vm1, %v3370_v20  ;;  %v3347_v31 = vmax.f32 %v3263_v23, 0.0 }
 0x565   :  { %v3258_v17 = vadd.f32 %v6028_v32, %v3257_v14  ;;  %v3345_v30 = vmax.f32 %v3255_v41, 0.0 }
 0x566   :  { %v3348_v3 = vmax.f32 %v3266_v21, 0.0 }
 0x567   :  { %v3346_v2 = vmax.f32 %v3258_v17, 0.0 }
 0x568   :  { %v3372_v25 = vpack.c.bf16 %v3348_v3, %v3347_v31 }
 0x569   :  { %v3371_v39 = vpack.c.bf16 %v3346_v2, %v3345_v30  ;;  %v4359_v15 = vpop.f32.mrb[96].mxu1 }
 0x56a   :  { %v3279_v40 = vadd.f32 %v4359_v15, %v6028_v32  ;;  %v3270_v53 = vpop.f32.mrb[97].mxu1 }
 0x56b   :  { %v3271_v8 = vadd.f32 %v6028_v32, %v3270_v53  ;;  %v4360_v13 = vpop.f32.mrb[98].mxu1  ;;  %4389 = vmatprep.mubr.msk.bf16.mxu0 %vm158_vm1, %v3371_v39 }
 0x56c   :  { %v3282_v58 = vadd.f32 %v4360_v13, %v6028_v32  ;;  %v3273_v54 = vpop.f32.mrb[99].mxu1  ;;  %4390 = vmatmul.mubr.msk.bf16.gmra.mrb[92].mxu0 %vm158_vm1, %v3372_v25  ;;  %v3351_v49 = vmax.f32 %v3279_v40, 0.0 }
 0x56d   :  { %v3274_v5 = vadd.f32 %v6028_v32, %v3273_v54  ;;  %v3349_v9 = vmax.f32 %v3271_v8, 0.0 }
 0x56e   :  { %v3352_v51 = vmax.f32 %v3282_v58, 0.0 }
 0x56f   :  { %v3350_v19 = vmax.f32 %v3274_v5, 0.0 }
 0x570   :  { %v3374_v7 = vpack.c.bf16 %v3352_v51, %v3351_v49 }
 0x571   :  { %v3373_v6 = vpack.c.bf16 %v3350_v19, %v3349_v9  ;;  %v4363_v43 = vpop.f32.mrb[100].mxu1 }
 0x572   :  { %v3295_v26 = vadd.f32 %v4363_v43, %v6028_v32  ;;  %v3286_v57 = vpop.f32.mrb[101].mxu1 }
 0x573   :  { %v3287_v29 = vadd.f32 %v6028_v32, %v3286_v57  ;;  %v4364_v45 = vpop.f32.mrb[102].mxu1  ;;  %4393 = vmatprep.mubr.msk.bf16.mxu0 %vm158_vm1, %v3373_v6 }
 0x574   :  { %v3298_v42 = vadd.f32 %v4364_v45, %v6028_v32  ;;  %v3289_v36 = vpop.f32.mrb[103].mxu1  ;;  %4394 = vmatmul.mubr.msk.bf16.gmra.mrb[96].mxu0 %vm158_vm1, %v3374_v7  ;;  %v3355_v61 = vmax.f32 %v3295_v26, 0.0 }
 0x575   :  { %v3290_v35 = vadd.f32 %v6028_v32, %v3289_v36  ;;  %v3353_v0 = vmax.f32 %v3287_v29, 0.0 }
 0x576   :  { %v3356_v63 = vmax.f32 %v3298_v42, 0.0 }
 0x577   :  { %v3354_v16 = vmax.f32 %v3290_v35, 0.0 }
 0x578   :  { %v3376_v10 = vpack.c.bf16 %v3356_v63, %v3355_v61 }
 0x579   :  { %v3375_v12 = vpack.c.bf16 %v3354_v16, %v3353_v0  ;;  %v4367_v60 = vpop.f32.mrb[104].mxu1 }
 0x57a   :  { %v3311_v50 = vadd.f32 %v4367_v60, %v6028_v32  ;;  %v3302_v22 = vpop.f32.mrb[105].mxu1 }
 0x57b   :  { %v3303_v11 = vadd.f32 %v6028_v32, %v3302_v22  ;;  %v4368_v46 = vpop.f32.mrb[106].mxu1  ;;  %4397 = vmatprep.mubr.msk.bf16.mxu0 %vm158_vm1, %v3375_v12 }
 0x57c   :  { %v3314_v38 = vadd.f32 %v4368_v46, %v6028_v32  ;;  %v3305_v47 = vpop.f32.mrb[107].mxu1  ;;  %4398 = vmatmul.mubr.msk.bf16.gmra.mrb[100].mxu0 %vm158_vm1, %v3376_v10  ;;  %v3359_v27 = vmax.f32 %v3311_v50, 0.0 }
 0x57d   :  { %v3306_v52 = vadd.f32 %v6028_v32, %v3305_v47  ;;  %v3357_v28 = vmax.f32 %v3303_v11, 0.0 }
 0x57e   :  { %v3360_v48 = vmax.f32 %v3314_v38, 0.0 }
 0x57f   :  { %v3358_v55 = vmax.f32 %v3306_v52, 0.0 }
 0x580   :  { %v3378_v34 = vpack.c.bf16 %v3360_v48, %v3359_v27 }
 0x581   :  { %v3377_v4 = vpack.c.bf16 %v3358_v55, %v3357_v28  ;;  %v4371_v33 = vpop.f32.mrb[108].mxu1 }
 0x582   :  { %v3327_v44 = vadd.f32 %v4371_v33, %v6028_v32  ;;  %v3318_v24 = vpop.f32.mrb[109].mxu1 }
 0x583   :  { %v3319_v56 = vadd.f32 %v6028_v32, %v3318_v24  ;;  %v4372_v59 = vpop.f32.mrb[110].mxu1  ;;  %4401 = vmatprep.mubr.msk.bf16.mxu0 %vm158_vm1, %v3377_v4 }
 0x584   :  { %v3330_v20 = vadd.f32 %v4372_v59, %v6028_v32  ;;  %v3321_v62 = vpop.f32.mrb[111].mxu1  ;;  %4402 = vmatmul.mubr.msk.bf16.gmra.mrb[104].mxu0 %vm158_vm1, %v3378_v34  ;;  %v3363_v23 = vmax.f32 %v3327_v44, 0.0 }
 0x585   :  { %v3322_v18 = vadd.f32 %v6028_v32, %v3321_v62  ;;  %v3361_v41 = vmax.f32 %v3319_v56, 0.0 }
 0x586   :  { %v3364_v37 = vmax.f32 %v3330_v20, 0.0 }
 0x587   :  { %v3362_v1 = vmax.f32 %v3322_v18, 0.0 }
 0x588   :  { %v3380_v21 = vpack.c.bf16 %v3364_v37, %v3363_v23 }
 0x589   :  { %v3379_v14 = vpack.c.bf16 %v3362_v1, %v3361_v41 }
 0x58b   :  { %4405 = vmatprep.mubr.msk.bf16.mxu0 %vm158_vm1, %v3379_v14 }
 0x58c   :  { %4406 = vmatmul.mubr.msk.bf16.gmra.mrb[108].mxu0 %vm158_vm1, %v3380_v21 }
 0x58d   :  { %4755 = shalt.err (!%p4752_p6)
}
 0x58e   :  { %s4756_s20 = scalar_lea.hbm %s6264_s8, 512 }
 0x58f   :  { %p4757_p7 = scmp.ne.s32.totalorder %s6264_s8, %s4756_s20  ;;  %p4760_p8 = scmp.lt.u32.totalorder %s4756_s20, %s6264_s8 }
 0x591   :  { %p4762_p9 = pnand %p4760_p8, %p4757_p7 }
 0x593   :  { %4765 = shalt.err (!%p4762_p9)
}
 0x594   :  { %s4788_s25 = smov 256   ;;  %v6094_v32 = vstv %s6263_s7  ;;  %vm3800_vm8 = vcmask 7168  }
 0x595   :  { %3844 = dma.vmem_to_hbm [thread:$0]  %s3839_s16, 512, %s6264_s8, [#allocation5], %s4788_s25, %s4788_s25, %s4781_s2  }
 0x627   :  { %v4379_v17 = vpop.f32.mrb[80].mxu0 }
 0x628   :  { %v3490_v31 = vadd.f32 %v4379_v17, %v6094_v32  ;;  %v3481_v3 = vpop.f32.mrb[81].mxu0 }
 0x629   :  { %v3482_v30 = vadd.f32 %v3481_v3, %v6094_v32  ;;  %v4380_v2 = vpop.f32.mrb[82].mxu0 }
 0x62a   :  { %v3949_v25 = vmul.f32 -1.442695, %v3490_v31  ;;  %v3493_v39 = vadd.f32 %v4380_v2, %v6094_v32  ;;  %v3484_v15 = vpop.f32.mrb[83].mxu0 }
 0x62b   :  { %v3947_v40 = vmul.f32 -1.442695, %v3482_v30  ;;  %v3485_v53 = vadd.f32 %v3484_v15, %v6094_v32 }
 0x62c   :  { %4572 = vpow2.f32 %v3949_v25  ;;  %v3950_v8 = vmul.f32 -1.442695, %v3493_v39 }
 0x62d   :  { %4574 = vpow2.f32 %v3947_v40  ;;  %v3948_v13 = vmul.f32 -1.442695, %v3485_v53 }
 0x62e   :  { %4576 = vpow2.f32 %v3950_v8 }
 0x62f   :  { %4578 = vpow2.f32 %v3948_v13  ;;  %v4383_v58 = vpop.f32.mrb[84].mxu0 }
 0x630   :  { %v3506_v54 = vadd.f32 %v4383_v58, %v6094_v32  ;;  %v3497_v5 = vpop.f32.mrb[85].mxu0 }
 0x631   :  { %v3498_v49 = vadd.f32 %v3497_v5, %v6094_v32  ;;  %v4384_v51 = vpop.f32.mrb[86].mxu0 }
 0x632   :  { %v3953_v9 = vmul.f32 -1.442695, %v3506_v54  ;;  %v3509_v19 = vadd.f32 %v4384_v51, %v6094_v32  ;;  %v3500_v7 = vpop.f32.mrb[87].mxu0 }
 0x633   :  { %v3951_v6 = vmul.f32 -1.442695, %v3498_v49  ;;  %v3501_v43 = vadd.f32 %v3500_v7, %v6094_v32 }
 0x634   :  { %4580 = vpow2.f32 %v3953_v9  ;;  %v3954_v26 = vmul.f32 -1.442695, %v3509_v19 }
 0x635   :  { %4582 = vpow2.f32 %v3951_v6  ;;  %v3952_v57 = vmul.f32 -1.442695, %v3501_v43 }
 0x636   :  { %v4573_v29 = vpop.eup %4572  ;;  %4584 = vpow2.f32 %v3954_v26 }
 0x637   :  { %v4575_v45 = vpop.eup %4574  ;;  %v3706_v42 = vadd.f32 1.0, %v4573_v29  ;;  %4586 = vpow2.f32 %v3952_v57  ;;  %v4387_v36 = vpop.f32.mrb[88].mxu0 }
 0x638   :  { %v4577_v35 = vpop.eup %4576  ;;  %v3704_v61 = vadd.f32 1.0, %v4575_v45  ;;  %v3522_v63 = vadd.f32 %v4387_v36, %v6094_v32  ;;  %v3513_v0 = vpop.f32.mrb[89].mxu0 }
 0x639   :  { %v4579_v16 = vpop.eup %4578  ;;  %4588 = vrcp.f32 %v3706_v42  ;;  %v3707_v10 = vadd.f32 1.0, %v4577_v35  ;;  %v3514_v12 = vadd.f32 %v3513_v0, %v6094_v32  ;;  %v4388_v60 = vpop.f32.mrb[90].mxu0 }
 0x63a   :  { %4590 = vrcp.f32 %v3704_v61  ;;  %v3705_v50 = vadd.f32 1.0, %v4579_v16  ;;  %v3957_v22 = vmul.f32 -1.442695, %v3522_v63  ;;  %v3525_v11 = vadd.f32 %v4388_v60, %v6094_v32  ;;  %v3516_v46 = vpop.f32.mrb[91].mxu0 }
 0x63b   :  { %4592 = vrcp.f32 %v3707_v10  ;;  %v3955_v38 = vmul.f32 -1.442695, %v3514_v12  ;;  %v3517_v47 = vadd.f32 %v3516_v46, %v6094_v32 }
 0x63c   :  { %4594 = vrcp.f32 %v3705_v50  ;;  %v3958_v52 = vmul.f32 -1.442695, %v3525_v11 }
 0x63d   :  { %4596 = vpow2.f32 %v3957_v22  ;;  %v3956_v27 = vmul.f32 -1.442695, %v3517_v47 }
 0x63e   :  { %v4581_v48 = vpop.eup %4580  ;;  %4598 = vpow2.f32 %v3955_v38 }
 0x63f   :  { %v4583_v28 = vpop.eup %4582  ;;  %v3710_v55 = vadd.f32 1.0, %v4581_v48  ;;  %4600 = vpow2.f32 %v3958_v52  ;;  %v4391_v34 = vpop.f32.mrb[92].mxu0 }
 0x640   :  { %v4585_v4 = vpop.eup %4584  ;;  %v3708_v33 = vadd.f32 1.0, %v4583_v28  ;;  %4602 = vpow2.f32 %v3956_v27  ;;  %v3538_v44 = vadd.f32 %v4391_v34, %v6094_v32  ;;  %v3529_v24 = vpop.f32.mrb[93].mxu0 }
 0x641   :  { %v4587_v56 = vpop.eup %4586  ;;  %4604 = vrcp.f32 %v3710_v55  ;;  %v3711_v59 = vadd.f32 1.0, %v4585_v4  ;;  %v3530_v20 = vadd.f32 %v3529_v24, %v6094_v32  ;;  %v4392_v62 = vpop.f32.mrb[94].mxu0 }
 0x642   :  { %4606 = vrcp.f32 %v3708_v33  ;;  %v3709_v18 = vadd.f32 1.0, %v4587_v56  ;;  %v3961_v23 = vmul.f32 -1.442695, %v3538_v44  ;;  %v3541_v37 = vadd.f32 %v4392_v62, %v6094_v32  ;;  %v3532_v41 = vpop.f32.mrb[95].mxu0 }
 0x643   :  { %v4589_v1 = vpop.eup %4588  ;;  %4608 = vrcp.f32 %v3711_v59  ;;  %v3959_v21 = vmul.f32 -1.442695, %v3530_v20  ;;  %v3533_v14 = vadd.f32 %v3532_v41, %v6094_v32 }
 0x644   :  { %v4591_v17 = vpop.eup %4590  ;;  %3803 = vst.msk [vmem:[%s6265_s9 + $0x10] sm:$0xff] %vm3800_vm8, %v4589_v1  ;;  %4610 = vrcp.f32 %v3709_v18  ;;  %v3962_v31 = vmul.f32 -1.442695, %v3541_v37 }
 0x645   :  { %v4593_v3 = vpop.eup %4592  ;;  %3801 = vst.msk [vmem:[%s6265_s9] sm:$0xff] %vm3800_vm8, %v4591_v17  ;;  %4612 = vpow2.f32 %v3961_v23  ;;  %v3960_v30 = vmul.f32 -1.442695, %v3533_v14 }
 0x646   :  { %v4595_v2 = vpop.eup %4594  ;;  %3804 = vst.msk [vmem:[%s6265_s9 + $0x18] sm:$0xff] %vm3800_vm8, %v4593_v3  ;;  %4614 = vpow2.f32 %v3959_v21 }
 0x647   :  { %v4597_v25 = vpop.eup %4596  ;;  %3802 = vst.msk [vmem:[%s6265_s9 + $0x8] sm:$0xff] %vm3800_vm8, %v4595_v2  ;;  %4616 = vpow2.f32 %v3962_v31  ;;  %v4395_v39 = vpop.f32.mrb[96].mxu0 }
 0x648   :  { %v4599_v15 = vpop.eup %4598  ;;  %v3714_v40 = vadd.f32 1.0, %v4597_v25  ;;  %4618 = vpow2.f32 %v3960_v30  ;;  %v3554_v53 = vadd.f32 %v4395_v39, %v6094_v32  ;;  %v3545_v8 = vpop.f32.mrb[97].mxu0 }
 0x649   :  { %v4601_v13 = vpop.eup %4600  ;;  %v3712_v58 = vadd.f32 1.0, %v4599_v15  ;;  %v3546_v54 = vadd.f32 %v3545_v8, %v6094_v32  ;;  %v4396_v5 = vpop.f32.mrb[98].mxu0 }
 0x64a   :  { %v4603_v49 = vpop.eup %4602  ;;  %4620 = vrcp.f32 %v3714_v40  ;;  %v3715_v51 = vadd.f32 1.0, %v4601_v13  ;;  %v3965_v9 = vmul.f32 -1.442695, %v3554_v53  ;;  %v3557_v19 = vadd.f32 %v4396_v5, %v6094_v32  ;;  %v3548_v7 = vpop.f32.mrb[99].mxu0 }
 0x64b   :  { %v4605_v6 = vpop.eup %4604  ;;  %4622 = vrcp.f32 %v3712_v58  ;;  %v3713_v43 = vadd.f32 1.0, %v4603_v49  ;;  %v3963_v26 = vmul.f32 -1.442695, %v3546_v54  ;;  %v3549_v57 = vadd.f32 %v3548_v7, %v6094_v32 }
 0x64c   :  { %v4607_v29 = vpop.eup %4606  ;;  %3807 = vst.msk [vmem:[%s6265_s9 + $0x30] sm:$0xff] %vm3800_vm8, %v4605_v6  ;;  %4624 = vrcp.f32 %v3715_v51  ;;  %v3966_v45 = vmul.f32 -1.442695, %v3557_v19 }
 0x64d   :  { %v4609_v42 = vpop.eup %4608  ;;  %3805 = vst.msk [vmem:[%s6265_s9 + $0x20] sm:$0xff] %vm3800_vm8, %v4607_v29  ;;  %4626 = vrcp.f32 %v3713_v43  ;;  %v3964_v36 = vmul.f32 -1.442695, %v3549_v57 }
 0x64e   :  { %v4611_v35 = vpop.eup %4610  ;;  %3808 = vst.msk [vmem:[%s6265_s9 + $0x38] sm:$0xff] %vm3800_vm8, %v4609_v42  ;;  %4628 = vpow2.f32 %v3965_v9 }
 0x64f   :  { %v4613_v61 = vpop.eup %4612  ;;  %3806 = vst.msk [vmem:[%s6265_s9 + $0x28] sm:$0xff] %vm3800_vm8, %v4611_v35  ;;  %4630 = vpow2.f32 %v3963_v26  ;;  %v4399_v63 = vpop.f32.mrb[100].mxu0 }
 0x650   :  { %v4615_v0 = vpop.eup %4614  ;;  %v3718_v16 = vadd.f32 1.0, %v4613_v61  ;;  %4632 = vpow2.f32 %v3966_v45  ;;  %v3570_v10 = vadd.f32 %v4399_v63, %v6094_v32  ;;  %v3561_v12 = vpop.f32.mrb[101].mxu0 }
 0x651   :  { %v4617_v60 = vpop.eup %4616  ;;  %v3716_v50 = vadd.f32 1.0, %v4615_v0  ;;  %4634 = vpow2.f32 %v3964_v36  ;;  %v3562_v22 = vadd.f32 %v3561_v12, %v6094_v32  ;;  %v4400_v11 = vpop.f32.mrb[102].mxu0 }
 0x652   :  { %v4619_v46 = vpop.eup %4618  ;;  %4636 = vrcp.f32 %v3718_v16  ;;  %v3719_v38 = vadd.f32 1.0, %v4617_v60  ;;  %v3969_v47 = vmul.f32 -1.442695, %v3570_v10  ;;  %v3573_v52 = vadd.f32 %v4400_v11, %v6094_v32  ;;  %v3564_v27 = vpop.f32.mrb[103].mxu0 }
 0x653   :  { %4638 = vrcp.f32 %v3716_v50  ;;  %v3717_v48 = vadd.f32 1.0, %v4619_v46  ;;  %v3967_v28 = vmul.f32 -1.442695, %v3562_v22  ;;  %v3565_v55 = vadd.f32 %v3564_v27, %v6094_v32 }
 0x654   :  { %v4621_v34 = vpop.eup %4620  ;;  %4640 = vrcp.f32 %v3719_v38  ;;  %v3970_v4 = vmul.f32 -1.442695, %v3573_v52 }
 0x655   :  { %v4623_v33 = vpop.eup %4622  ;;  %3811 = vst.msk [vmem:[%s6265_s9 + $0x50] sm:$0xff] %vm3800_vm8, %v4621_v34  ;;  %4642 = vrcp.f32 %v3717_v48  ;;  %v3968_v44 = vmul.f32 -1.442695, %v3565_v55 }
 0x656   :  { %v4625_v24 = vpop.eup %4624  ;;  %3809 = vst.msk [vmem:[%s6265_s9 + $0x40] sm:$0xff] %vm3800_vm8, %v4623_v33  ;;  %4644 = vpow2.f32 %v3969_v47 }
 0x657   :  { %v4627_v56 = vpop.eup %4626  ;;  %3812 = vst.msk [vmem:[%s6265_s9 + $0x58] sm:$0xff] %vm3800_vm8, %v4625_v24  ;;  %4646 = vpow2.f32 %v3967_v28  ;;  %v4403_v59 = vpop.f32.mrb[104].mxu0 }
 0x658   :  { %v4629_v20 = vpop.eup %4628  ;;  %3810 = vst.msk [vmem:[%s6265_s9 + $0x48] sm:$0xff] %vm3800_vm8, %v4627_v56  ;;  %4648 = vpow2.f32 %v3970_v4  ;;  %v3586_v62 = vadd.f32 %v4403_v59, %v6094_v32  ;;  %v3577_v18 = vpop.f32.mrb[105].mxu0 }
 0x659   :  { %v4631_v23 = vpop.eup %4630  ;;  %v3722_v37 = vadd.f32 1.0, %v4629_v20  ;;  %4650 = vpow2.f32 %v3968_v44  ;;  %v3578_v41 = vadd.f32 %v3577_v18, %v6094_v32  ;;  %v4404_v1 = vpop.f32.mrb[106].mxu0 }
 0x65a   :  { %v4633_v21 = vpop.eup %4632  ;;  %v3720_v14 = vadd.f32 1.0, %v4631_v23  ;;  %v3589_v17 = vadd.f32 %v4404_v1, %v6094_v32  ;;  %v3580_v31 = vpop.f32.mrb[107].mxu0  ;;  %v3973_v2 = vmul.f32 -1.442695, %v3586_v62 }
 0x65b   :  { %v4635_v3 = vpop.eup %4634  ;;  %4652 = vrcp.f32 %v3722_v37  ;;  %v3723_v30 = vadd.f32 1.0, %v4633_v21  ;;  %v3581_v25 = vadd.f32 %v3580_v31, %v6094_v32  ;;  %v3971_v40 = vmul.f32 -1.442695, %v3578_v41 }
 0x65c   :  { %v4637_v39 = vpop.eup %4636  ;;  %4654 = vrcp.f32 %v3720_v14  ;;  %v3721_v15 = vadd.f32 1.0, %v4635_v3  ;;  %v3974_v8 = vmul.f32 -1.442695, %v3589_v17 }
 0x65d   :  { %v4639_v53 = vpop.eup %4638  ;;  %3815 = vst.msk [vmem:[%s6265_s9 + $0x70] sm:$0xff] %vm3800_vm8, %v4637_v39  ;;  %4656 = vrcp.f32 %v3723_v30  ;;  %v3972_v58 = vmul.f32 -1.442695, %v3581_v25 }
 0x65e   :  { %v4641_v13 = vpop.eup %4640  ;;  %3813 = vst.msk [vmem:[%s6265_s9 + $0x60] sm:$0xff] %vm3800_vm8, %v4639_v53  ;;  %4658 = vrcp.f32 %v3721_v15 }
 0x65f   :  { %v4643_v54 = vpop.eup %4642  ;;  %3816 = vst.msk [vmem:[%s6265_s9 + $0x78] sm:$0xff] %vm3800_vm8, %v4641_v13  ;;  %4660 = vpow2.f32 %v3973_v2  ;;  %v4407_v5 = vpop.f32.mrb[108].mxu0 }
 0x660   :  { %v4645_v49 = vpop.eup %4644  ;;  %3814 = vst.msk [vmem:[%s6265_s9 + $0x68] sm:$0xff] %vm3800_vm8, %v4643_v54  ;;  %4662 = vpow2.f32 %v3971_v40  ;;  %v3602_v51 = vadd.f32 %v4407_v5, %v6094_v32  ;;  %v3593_v9 = vpop.f32.mrb[109].mxu0 }
 0x661   :  { %v4647_v19 = vpop.eup %4646  ;;  %v3726_v7 = vadd.f32 1.0, %v4645_v49  ;;  %4664 = vpow2.f32 %v3974_v8  ;;  %v3594_v6 = vadd.f32 %v3593_v9, %v6094_v32  ;;  %v4408_v43 = vpop.f32.mrb[110].mxu0 }
 0x662   :  { %v4649_v26 = vpop.eup %4648  ;;  %v3724_v57 = vadd.f32 1.0, %v4647_v19  ;;  %4666 = vpow2.f32 %v3972_v58  ;;  %v3605_v29 = vadd.f32 %v4408_v43, %v6094_v32  ;;  %v3596_v45 = vpop.f32.mrb[111].mxu0  ;;  %v3977_v35 = vmul.f32 -1.442695, %v3602_v51 }
 0x663   :  { %v4651_v42 = vpop.eup %4650  ;;  %4668 = vrcp.f32 %v3726_v7  ;;  %v3727_v36 = vadd.f32 1.0, %v4649_v26  ;;  %v3597_v61 = vadd.f32 %v3596_v45, %v6094_v32  ;;  %v3975_v0 = vmul.f32 -1.442695, %v3594_v6 }
 0x664   :  { %4670 = vrcp.f32 %v3724_v57  ;;  %v3725_v63 = vadd.f32 1.0, %v4651_v42  ;;  %v3978_v10 = vmul.f32 -1.442695, %v3605_v29 }
 0x665   :  { %v4653_v16 = vpop.eup %4652  ;;  %4672 = vrcp.f32 %v3727_v36  ;;  %v3976_v60 = vmul.f32 -1.442695, %v3597_v61 }
 0x666   :  { %v4655_v12 = vpop.eup %4654  ;;  %3819 = vst.msk [vmem:[%s6265_s9 + $0x90] sm:$0xff] %vm3800_vm8, %v4653_v16  ;;  %4674 = vrcp.f32 %v3725_v63 }
 0x667   :  { %v4657_v50 = vpop.eup %4656  ;;  %3817 = vst.msk [vmem:[%s6265_s9 + $0x80] sm:$0xff] %vm3800_vm8, %v4655_v12  ;;  %4676 = vpow2.f32 %v3977_v35 }
 0x668   :  { %v4659_v32 = vpop.eup %4658  ;;  %3820 = vst.msk [vmem:[%s6265_s9 + $0x98] sm:$0xff] %vm3800_vm8, %v4657_v50  ;;  %4678 = vpow2.f32 %v3975_v0 }
 0x669   :  { %v4661_v22 = vpop.eup %4660  ;;  %3818 = vst.msk [vmem:[%s6265_s9 + $0x88] sm:$0xff] %vm3800_vm8, %v4659_v32  ;;  %4680 = vpow2.f32 %v3978_v10 }
 0x66a   :  { %v4663_v11 = vpop.eup %4662  ;;  %v3730_v46 = vadd.f32 1.0, %v4661_v22  ;;  %4682 = vpow2.f32 %v3976_v60 }
 0x66b   :  { %v4665_v38 = vpop.eup %4664  ;;  %v3728_v47 = vadd.f32 1.0, %v4663_v11 }
 0x66c   :  { %v4667_v52 = vpop.eup %4666  ;;  %4684 = vrcp.f32 %v3730_v46  ;;  %v3731_v27 = vadd.f32 1.0, %v4665_v38 }
 0x66d   :  { %v4669_v48 = vpop.eup %4668  ;;  %4686 = vrcp.f32 %v3728_v47  ;;  %v3729_v28 = vadd.f32 1.0, %v4667_v52 }
 0x66e   :  { %v4671_v55 = vpop.eup %4670  ;;  %3823 = vst.msk [vmem:[%s6265_s9 + $0xb0] sm:$0xff] %vm3800_vm8, %v4669_v48  ;;  %4688 = vrcp.f32 %v3731_v27 }
 0x66f   :  { %v4673_v34 = vpop.eup %4672  ;;  %3821 = vst.msk [vmem:[%s6265_s9 + $0xa0] sm:$0xff] %vm3800_vm8, %v4671_v55  ;;  %4690 = vrcp.f32 %v3729_v28 }
 0x670   :  { %v4675_v4 = vpop.eup %4674  ;;  %3824 = vst.msk [vmem:[%s6265_s9 + $0xb8] sm:$0xff] %vm3800_vm8, %v4673_v34 }
 0x671   :  { %v4677_v33 = vpop.eup %4676  ;;  %3822 = vst.msk [vmem:[%s6265_s9 + $0xa8] sm:$0xff] %vm3800_vm8, %v4675_v4 }
 0x672   :  { %v4679_v44 = vpop.eup %4678  ;;  %v3734_v24 = vadd.f32 1.0, %v4677_v33 }
 0x673   :  { %v4681_v56 = vpop.eup %4680  ;;  %v3732_v59 = vadd.f32 1.0, %v4679_v44 }
 0x674   :  { %v4683_v20 = vpop.eup %4682  ;;  %4692 = vrcp.f32 %v3734_v24  ;;  %v3735_v62 = vadd.f32 1.0, %v4681_v56 }
 0x675   :  { %4694 = vrcp.f32 %v3732_v59  ;;  %v3733_v18 = vadd.f32 1.0, %v4683_v20 }
 0x676   :  { %v4685_v23 = vpop.eup %4684  ;;  %4696 = vrcp.f32 %v3735_v62 }
 0x677   :  { %v4687_v37 = vpop.eup %4686  ;;  %3827 = vst.msk [vmem:[%s6265_s9 + $0xd0] sm:$0xff] %vm3800_vm8, %v4685_v23  ;;  %4698 = vrcp.f32 %v3733_v18 }
 0x678   :  { %v4689_v41 = vpop.eup %4688  ;;  %3825 = vst.msk [vmem:[%s6265_s9 + $0xc0] sm:$0xff] %vm3800_vm8, %v4687_v37 }
 0x679   :  { %v4691_v1 = vpop.eup %4690  ;;  %3828 = vst.msk [vmem:[%s6265_s9 + $0xd8] sm:$0xff] %vm3800_vm8, %v4689_v41 }
 0x67a   :  { %3826 = vst.msk [vmem:[%s6265_s9 + $0xc8] sm:$0xff] %vm3800_vm8, %v4691_v1 }
 0x67e   :  { %v4693_v21 = vpop.eup %4692 }
 0x67f   :  { %v4695_v14 = vpop.eup %4694  ;;  %3831 = vst.msk [vmem:[%s6265_s9 + $0xf0] sm:$0xff] %vm3800_vm8, %v4693_v21 }
 0x680   :  { %v4697_v17 = vpop.eup %4696  ;;  %3829 = vst.msk [vmem:[%s6265_s9 + $0xe0] sm:$0xff] %vm3800_vm8, %v4695_v14 }
 0x681   :  { %v4699_v31 = vpop.eup %4698  ;;  %3832 = vst.msk [vmem:[%s6265_s9 + $0xf8] sm:$0xff] %vm3800_vm8, %v4697_v17 }
 0x682   :  { %3830 = vst.msk [vmem:[%s6265_s9 + $0xe8] sm:$0xff] %vm3800_vm8, %v4699_v31 }
 0x683   :  { %4770 = dma.done.wait [#allocation5], 512  }
 0x684   :  { %4771 = vsyncadd [#allocation5], 4294966784 }
 0x685   :  { %3852 = vsyncpa [#allocation4], 1 }
 0x686   :  { %3853 = vsyncpa [#allocation7], 1 }
 0x687   :  { %3854 = vsyncpa [#allocation5], 1 }

</bundles_post_ra>
